<compile_context>
chip_gen: v5e
topology: v5e:2x2
jax: 0.10.0
libtpu: 0.0.40
codegen_flags: <defaults>
</compile_context>

<pallas_src>
import math

import numpy as np
import jax
import jax.numpy as jnp
from jax.experimental import pallas as pl
from jax.experimental.pallas import tpu as pltpu


# ----------------------------- KNRM hyper-params -----------------------------
KERNEL_NUM = 21
SIGMA = 0.1
EXACT_SIGMA = 0.001
OUT_LAYERS = [10, 5]  # MLP: 21 -> 10 -> 5 -> 1 (ReLU on hidden layers only)


def _gaussian_kernel_params(kernel_num, sigma, exact_sigma):
    """Reproduces KNRM._get_kernels_layers()."""
    mus, sigmas = [], []
    for i in range(kernel_num):
        mu = 1.0 / (kernel_num - 1) + 2.0 * i / (kernel_num - 1) - 1.0
        sg = sigma
        if mu > 1.0:
            sg = exact_sigma
            mu = 1.0
        mus.append(mu)
        sigmas.append(sg)
    return np.asarray(mus, np.float32), np.asarray(sigmas, np.float32)


# --------------------------------- the kernel --------------------------------
def knrm_kernel(q_ref, dt_ref, mus_ref, nis_ref, dsum_ref,
                w1_ref, b1_ref, w2_ref, b2_ref, w3_ref, b3_ref,
                out_ref):
    # q_ref : [2, BT, Lq, D]   queries of both pairs for this batch tile
    # dt_ref: [2, BT, D, Ld]   documents, already embedded + transposed
    # mus_ref/nis_ref: [K, 1]  kernel centers and (-0.5 / sigma^2)
    # dsum_ref: [Lq*Ld, Lq]    block-ones selector for the doc-position sum
    _, bt, lq, d = q_ref.shape
    ld = dt_ref.shape[-1]
    p = 2 * bt                       # number of (query, doc) pairs in this tile
    k = mus_ref.shape[0]

    # Fold (pair, batch) into one leading axis: p = pair * BT + bt.
    q = q_ref[...].reshape(p, lq, d)       # [P, Lq, D]
    dt = dt_ref[...].reshape(p, d, ld)     # [P, D, Ld]

    # F.normalize(x, p=2, dim=-1) == x * rsqrt(max(sum(x^2), eps^2))
    qs = jnp.sum(q * q, axis=-1, keepdims=True)              # [P, Lq, 1]
    qn = q * jax.lax.rsqrt(jnp.maximum(qs, 1e-24))
    ds = jnp.sum(dt * dt, axis=1, keepdims=True)             # [P, 1, Ld]
    dn = dt * jax.lax.rsqrt(jnp.maximum(ds, 1e-24))

    # Matching matrices for all pairs, batched on the MXU: [P, Lq, Ld].
    mm = jnp.einsum('pld,pdr->plr', qn, dn,
                    preferred_element_type=jnp.float32)
    # Lane-dense layout for the Gaussian bank: (Lq*Ld) on the lane axis.
    mm2 = mm.reshape(p, lq * ld)                              # [P, Lq*Ld]

    # Gaussian kernels: K on sublanes, Lq*Ld on lanes -> exp on dense vregs.
    diff = mm2[:, None, :] - mus_ref[...]                     # [P, K, Lq*Ld]
    phi = jnp.exp(diff * diff * nis_ref[...])                 # [P, K, Lq*Ld]

    # Sum over doc positions on the MXU: phi @ block-ones selector.
    sel = jnp.broadcast_to(dsum_ref[...], (p, lq * ld, lq))   # [P, Lq*Ld, Lq]
    soft_tf = jnp.einsum('pkj,pjl->pkl', phi, sel,
                         preferred_element_type=jnp.float32)  # [P, K, Lq]
    # log1p then sum over query positions (lane reduce) -> soft-TF features.
    feats = jnp.sum(jnp.log1p(soft_tf), axis=-1)              # [P, K]

    # Tiny MLP, batched over all pairs of this tile (3 MXU pushes total).
    h = jnp.maximum(
        jnp.dot(feats, w1_ref[...], preferred_element_type=jnp.float32)
        + b1_ref[...], 0.0)
    h = jnp.maximum(
        jnp.dot(h, w2_ref[...], preferred_element_type=jnp.float32)
        + b2_ref[...], 0.0)
    logits = (jnp.dot(h, w3_ref[...], preferred_element_type=jnp.float32)
              + b3_ref[...])                                  # [P, 1]

    # Rows [:BT] are pair 1, rows [BT:] are pair 2 (pair-major stacking).
    dlog = logits[:bt, :] - logits[bt:, :]                    # [BT, 1]
    out_ref[...] = jax.nn.sigmoid(dlog).reshape(1, 1, bt)


# --------------------------------- wrapper -----------------------------------
def knrm_forward(params, query_1, doc_1, query_2, doc_2, *, block_b=4):
    emb = params["embedding"]
    D = emb.shape[1]
    B, Lq = query_1.shape
    Ld = doc_1.shape[1]
    K = params["mus"].shape[0]
    H1 = params["w1"].shape[1]
    H2 = params["w2"].shape[1]

    # Embedding lookup (data-dependent gather, glue kept in plain JAX) and
    # pair fusion: stack (pair_1, pair_2) on a leading axis -> 2 inputs, not 4.
    eq = jnp.take(emb, jnp.stack([query_1, query_2], axis=0), axis=0)   # [2,B,Lq,D]
    ed = jnp.take(emb, jnp.stack([doc_1, doc_2], axis=0), axis=0)       # [2,B,Ld,D]
    edt = jnp.swapaxes(ed, -1, -2)                                      # [2,B,D,Ld]

    # Batch tiling: BT batch elements (= 2*BT pairs) per program.
    BT = min(block_b, B)
    nt = pl.cdiv(B, BT)
    Bp = nt * BT
    if Bp != B:
        pad = Bp - B
        eq = jnp.pad(eq, ((0, 0), (0, pad), (0, 0), (0, 0)))
        edt = jnp.pad(edt, ((0, 0), (0, pad), (0, 0), (0, 0)))

    # Doc-position summation selector: dsum[l*Ld + r, l'] = 1 iff l == l'.
    dsum = jnp.repeat(jnp.eye(Lq, dtype=jnp.float32), Ld, axis=0)        # [Lq*Ld, Lq]

    full2d = lambda shape: pl.BlockSpec(shape, lambda i: (0, 0))

    out = pl.pallas_call(
        knrm_kernel,
        out_shape=jax.ShapeDtypeStruct((nt, 1, BT), jnp.float32),
        grid=(nt,),
        in_specs=[
            pl.BlockSpec((2, BT, Lq, D), lambda i: (0, i, 0, 0)),  # queries (both pairs)
            pl.BlockSpec((2, BT, D, Ld), lambda i: (0, i, 0, 0)),  # docs, pre-transposed
            full2d((K, 1)),                                        # mus
            full2d((K, 1)),                                        # -0.5 / sigma^2
            full2d((Lq * Ld, Lq)),                                 # doc-sum selector
            full2d((K, H1)),                                       # W1
            full2d((1, H1)),                                       # b1
            full2d((H1, H2)),                                      # W2
            full2d((1, H2)),                                       # b2
            full2d((H2, 1)),                                       # W3
            full2d((1, 1)),                                        # b3
        ],
        # Each program owns its own lane-dense output block -> the batch grid
        # axis can be sharded across TensorCores ("parallel").
        out_specs=pl.BlockSpec((1, 1, BT), lambda i: (i, 0, 0)),
        compiler_params=pltpu.CompilerParams(
            dimension_semantics=("parallel",)),
    )(eq, edt,
      params["mus"], params["neg_half_inv_sig2"], dsum,
      params["w1"], params["b1"], params["w2"], params["b2"],
      params["w3"], params["b3"])

    return out.reshape(Bp)[:B].reshape(B, 1)


# ----------------------------- deterministic init ----------------------------
def init_params(key, vocab_size, emb_dim):
    mus_np, sigmas_np = _gaussian_kernel_params(KERNEL_NUM, SIGMA, EXACT_SIGMA)

    k_emb, k1w, k1b, k2w, k2b, k3w, k3b = jax.random.split(key, 7)

    emb = 0.1 * jax.random.normal(k_emb, (vocab_size, emb_dim), jnp.float32)
    emb = emb.at[0].set(0.0)  # padding_idx=0 row

    def linear(kw, kb, fan_in, fan_out):
        bound = 1.0 / math.sqrt(fan_in)
        w = jax.random.uniform(kw, (fan_in, fan_out), jnp.float32, -bound, bound)
        b = jax.random.uniform(kb, (1, fan_out), jnp.float32, -bound, bound)
        return w, b

    dims = [KERNEL_NUM] + OUT_LAYERS + [1]  # [21, 10, 5, 1]
    w1, b1 = linear(k1w, k1b, dims[0], dims[1])
    w2, b2 = linear(k2w, k2b, dims[1], dims[2])
    w3, b3 = linear(k3w, k3b, dims[2], dims[3])

    return {
        "embedding": emb,
        "mus": jnp.asarray(mus_np).reshape(KERNEL_NUM, 1),
        "neg_half_inv_sig2": jnp.asarray(-0.5 / (sigmas_np ** 2)).reshape(KERNEL_NUM, 1),
        "w1": w1, "b1": b1, "w2": w2, "b2": b2, "w3": w3, "b3": b3,
    }


# ------------------------------ pure-JAX reference ----------------------------
def knrm_reference(params, q1, d1, q2, d2):
    emb = params["embedding"]
    mus = params["mus"][:, 0]
    nis = params["neg_half_inv_sig2"][:, 0]

    def predict(q, d):
        eq, ed = emb[q], emb[d]
        nrm = lambda x: x / jnp.maximum(
            jnp.sqrt(jnp.sum(x * x, axis=-1, keepdims=True)), 1e-12)
        mm = jnp.einsum('bld,brd->blr', nrm(eq), nrm(ed))
        phi = jnp.exp(((mm[..., None] - mus) ** 2) * nis)        # [B, Lq, Ld, K]
        feats = jnp.sum(jnp.log1p(jnp.sum(phi, axis=2)), axis=1)  # [B, K]
        h = jnp.maximum(feats @ params["w1"] + params["b1"], 0.0)
        h = jnp.maximum(h @ params["w2"] + params["b2"], 0.0)
        return h @ params["w3"] + params["b3"]

    return jax.nn.sigmoid(predict(q1, d1) - predict(q2, d2))


# ----------------------------------- main ------------------------------------
if __name__ == "__main__":
    # Lq * Ld = 128 -> the Gaussian bank is exactly lane-dense at these shapes.
    B, Lq, Ld, VOCAB, EMB_DIM = 8, 8, 16, 50, 32

    key = jax.random.PRNGKey(0)
    kp, kq1, kd1, kq2, kd2 = jax.random.split(key, 5)
    params = init_params(kp, VOCAB, EMB_DIM)

    query_1 = jax.random.randint(kq1, (B, Lq), 0, VOCAB)
    doc_1 = jax.random.randint(kd1, (B, Ld), 0, VOCAB)
    query_2 = jax.random.randint(kq2, (B, Lq), 0, VOCAB)
    doc_2 = jax.random.randint(kd2, (B, Ld), 0, VOCAB)

    out = knrm_forward(params, query_1, doc_1, query_2, doc_2, block_b=4)
    out = jax.block_until_ready(out)

    ref = jax.block_until_ready(knrm_reference(params, query_1, doc_1, query_2, doc_2))

    assert out.shape == (B, 1), out.shape
    np.testing.assert_allclose(np.asarray(out), np.asarray(ref), rtol=1e-4, atol=1e-5)

    print("KERNEL_OK")
</pallas_src>

<mosaic_0001>
module attributes {stable_mosaic.version = 11 : i64} {
  func.func @knrm_kernel(%arg0: i32, %arg1: memref<2x4x8x32xf32, #tpu.memory_space<vmem>>, %arg2: memref<2x4x32x16xf32, #tpu.memory_space<vmem>>, %arg3: memref<21x1xf32, #tpu.memory_space<vmem>>, %arg4: memref<21x1xf32, #tpu.memory_space<vmem>>, %arg5: memref<128x8xf32, #tpu.memory_space<vmem>>, %arg6: memref<21x10xf32, #tpu.memory_space<vmem>>, %arg7: memref<1x10xf32, #tpu.memory_space<vmem>>, %arg8: memref<10x5xf32, #tpu.memory_space<vmem>>, %arg9: memref<1x5xf32, #tpu.memory_space<vmem>>, %arg10: memref<5x1xf32, #tpu.memory_space<vmem>>, %arg11: memref<1x1xf32, #tpu.memory_space<vmem>>, %arg12: memref<1x1x4xf32, #tpu.memory_space<vmem>>) attributes {dimension_semantics = [#tpu.dimension_semantics<parallel>], iteration_bounds = array<i64: 2>, scalar_prefetch = 0 : i64, scratch_operands = 0 : i64, tpu.core_type = #tpu.core_type<tc>, window_params = [{transform_indices = @transform_0, window_bounds = array<i64: 2, 4, 8, 32>}, {transform_indices = @transform_1, window_bounds = array<i64: 2, 4, 32, 16>}, {pipeline_mode = #tpu.pipeline_mode<synchronous>, transform_indices = @transform_2, window_bounds = array<i64: 21, 1>}, {pipeline_mode = #tpu.pipeline_mode<synchronous>, transform_indices = @transform_3, window_bounds = array<i64: 21, 1>}, {pipeline_mode = #tpu.pipeline_mode<synchronous>, transform_indices = @transform_4, window_bounds = array<i64: 128, 8>}, {pipeline_mode = #tpu.pipeline_mode<synchronous>, transform_indices = @transform_5, window_bounds = array<i64: 21, 10>}, {pipeline_mode = #tpu.pipeline_mode<synchronous>, transform_indices = @transform_6, window_bounds = array<i64: 1, 10>}, {pipeline_mode = #tpu.pipeline_mode<synchronous>, transform_indices = @transform_7, window_bounds = array<i64: 10, 5>}, {pipeline_mode = #tpu.pipeline_mode<synchronous>, transform_indices = @transform_8, window_bounds = array<i64: 1, 5>}, {pipeline_mode = #tpu.pipeline_mode<synchronous>, transform_indices = @transform_9, window_bounds = array<i64: 5, 1>}, {pipeline_mode = #tpu.pipeline_mode<synchronous>, transform_indices = @transform_10, window_bounds = array<i64: 1, 1>}, {transform_indices = @transform_11, window_bounds = array<i64: 1, 1, 4>}]} {
    %c0 = arith.constant 0 : index
    %c0_0 = arith.constant 0 : index
    %c0_1 = arith.constant 0 : index
    %c0_2 = arith.constant 0 : index
    %0 = vector.load %arg1[%c0, %c0_0, %c0_1, %c0_2] : memref<2x4x8x32xf32, #tpu.memory_space<vmem>>, vector<2x4x8x32xf32>
    %1 = vector.shape_cast %0 : vector<2x4x8x32xf32> to vector<8x8x32xf32>
    %c0_3 = arith.constant 0 : index
    %c0_4 = arith.constant 0 : index
    %c0_5 = arith.constant 0 : index
    %c0_6 = arith.constant 0 : index
    %2 = vector.load %arg2[%c0_3, %c0_4, %c0_5, %c0_6] : memref<2x4x32x16xf32, #tpu.memory_space<vmem>>, vector<2x4x32x16xf32>
    %3 = vector.shape_cast %2 : vector<2x4x32x16xf32> to vector<8x32x16xf32>
    %4 = arith.mulf %1, %1 : vector<8x8x32xf32>
    %cst = arith.constant dense<0.000000e+00> : vector<8x8xf32>
    %5 = vector.multi_reduction <add>, %4, %cst [2] : vector<8x8x32xf32> to vector<8x8xf32>
    %6 = vector.shape_cast %5 : vector<8x8xf32> to vector<8x8x1xf32>
    %cst_7 = arith.constant 1.000000e-24 : f32
    %7 = vector.broadcast %cst_7 : f32 to vector<8x8x1xf32>
    %8 = arith.maximumf %6, %7 : vector<8x8x1xf32>
    %9 = math.rsqrt %8 : vector<8x8x1xf32>
    %10 = vector.broadcast %9 : vector<8x8x1xf32> to vector<8x8x32xf32>
    %11 = arith.mulf %1, %10 : vector<8x8x32xf32>
    %12 = arith.mulf %3, %3 : vector<8x32x16xf32>
    %cst_8 = arith.constant dense<0.000000e+00> : vector<8x16xf32>
    %13 = vector.multi_reduction <add>, %12, %cst_8 [1] : vector<8x32x16xf32> to vector<8x16xf32>
    %14 = vector.shape_cast %13 : vector<8x16xf32> to vector<8x1x16xf32>
    %cst_9 = arith.constant 1.000000e-24 : f32
    %15 = vector.broadcast %cst_9 : f32 to vector<8x1x16xf32>
    %16 = arith.maximumf %14, %15 : vector<8x1x16xf32>
    %17 = math.rsqrt %16 : vector<8x1x16xf32>
    %18 = vector.broadcast %17 : vector<8x1x16xf32> to vector<8x32x16xf32>
    %19 = arith.mulf %3, %18 : vector<8x32x16xf32>
    "tpu.trace_start"() <{level = 10 : i32, message = "pld,pdr->plr"}> : () -> ()
    %cst_10 = arith.constant dense<0.000000e+00> : vector<8x8x16xf32>
    %20 = tpu.matmul %11, %19, %cst_10 {dimension_numbers = #tpu.dot_dimension_numbers<[2], [1], [1], [2], [0, 0, 0, 1, 1, 2], [0], [0]>} : vector<8x8x32xf32>, vector<8x32x16xf32>, vector<8x8x16xf32> -> vector<8x8x16xf32>
    "tpu.trace_stop"() : () -> ()
    %21 = vector.shape_cast %20 : vector<8x8x16xf32> to vector<8x128xf32>
    %22 = vector.shape_cast %21 : vector<8x128xf32> to vector<8x1x128xf32>
    %c0_11 = arith.constant 0 : index
    %c0_12 = arith.constant 0 : index
    %23 = vector.load %arg3[%c0_11, %c0_12] : memref<21x1xf32, #tpu.memory_space<vmem>>, vector<21x1xf32>
    %24 = vector.shape_cast %23 : vector<21x1xf32> to vector<1x21x1xf32>
    %25 = vector.broadcast %22 : vector<8x1x128xf32> to vector<8x21x128xf32>
    %26 = vector.broadcast %24 : vector<1x21x1xf32> to vector<8x21x128xf32>
    %27 = arith.subf %25, %26 : vector<8x21x128xf32>
    %28 = arith.mulf %27, %27 : vector<8x21x128xf32>
    %c0_13 = arith.constant 0 : index
    %c0_14 = arith.constant 0 : index
    %29 = vector.load %arg4[%c0_13, %c0_14] : memref<21x1xf32, #tpu.memory_space<vmem>>, vector<21x1xf32>
    %30 = vector.shape_cast %29 : vector<21x1xf32> to vector<1x21x1xf32>
    %31 = vector.broadcast %30 : vector<1x21x1xf32> to vector<8x21x128xf32>
    %32 = arith.mulf %28, %31 : vector<8x21x128xf32>
    %33 = math.exp %32 : vector<8x21x128xf32>
    %c0_15 = arith.constant 0 : index
    %c0_16 = arith.constant 0 : index
    %34 = vector.load %arg5[%c0_15, %c0_16] : memref<128x8xf32, #tpu.memory_space<vmem>>, vector<128x8xf32>
    %35 = vector.shape_cast %34 : vector<128x8xf32> to vector<1x128x8xf32>
    %36 = vector.broadcast %35 : vector<1x128x8xf32> to vector<8x128x8xf32>
    "tpu.trace_start"() <{level = 10 : i32, message = "pkj,pjl->pkl"}> : () -> ()
    %cst_17 = arith.constant dense<0.000000e+00> : vector<8x21x8xf32>
    %37 = tpu.matmul %33, %36, %cst_17 {dimension_numbers = #tpu.dot_dimension_numbers<[2], [1], [1], [2], [0, 0, 0, 1, 1, 2], [0], [0]>} : vector<8x21x128xf32>, vector<8x128x8xf32>, vector<8x21x8xf32> -> vector<8x21x8xf32>
    "tpu.trace_stop"() : () -> ()
    %38 = math.log1p %37 : vector<8x21x8xf32>
    %cst_18 = arith.constant dense<0.000000e+00> : vector<8x21xf32>
    %39 = vector.multi_reduction <add>, %38, %cst_18 [2] : vector<8x21x8xf32> to vector<8x21xf32>
    %c0_19 = arith.constant 0 : index
    %c0_20 = arith.constant 0 : index
    %40 = vector.load %arg6[%c0_19, %c0_20] : memref<21x10xf32, #tpu.memory_space<vmem>>, vector<21x10xf32>
    %cst_21 = arith.constant dense<0.000000e+00> : vector<8x10xf32>
    %41 = tpu.matmul %39, %40, %cst_21 {dimension_numbers = #tpu.dot_dimension_numbers<[1], [0], [0], [1], [0, 0, 1, 1], [], []>} : vector<8x21xf32>, vector<21x10xf32>, vector<8x10xf32> -> vector<8x10xf32>
    %c0_22 = arith.constant 0 : index
    %c0_23 = arith.constant 0 : index
    %42 = vector.load %arg7[%c0_22, %c0_23] : memref<1x10xf32, #tpu.memory_space<vmem>>, vector<1x10xf32>
    %43 = vector.broadcast %42 : vector<1x10xf32> to vector<8x10xf32>
    %44 = arith.addf %41, %43 : vector<8x10xf32>
    %cst_24 = arith.constant 0.000000e+00 : f32
    %45 = vector.broadcast %cst_24 : f32 to vector<8x10xf32>
    %46 = arith.maximumf %44, %45 : vector<8x10xf32>
    %c0_25 = arith.constant 0 : index
    %c0_26 = arith.constant 0 : index
    %47 = vector.load %arg8[%c0_25, %c0_26] : memref<10x5xf32, #tpu.memory_space<vmem>>, vector<10x5xf32>
    %cst_27 = arith.constant dense<0.000000e+00> : vector<8x5xf32>
    %48 = tpu.matmul %46, %47, %cst_27 {dimension_numbers = #tpu.dot_dimension_numbers<[1], [0], [0], [1], [0, 0, 1, 1], [], []>} : vector<8x10xf32>, vector<10x5xf32>, vector<8x5xf32> -> vector<8x5xf32>
    %c0_28 = arith.constant 0 : index
    %c0_29 = arith.constant 0 : index
    %49 = vector.load %arg9[%c0_28, %c0_29] : memref<1x5xf32, #tpu.memory_space<vmem>>, vector<1x5xf32>
    %50 = vector.broadcast %49 : vector<1x5xf32> to vector<8x5xf32>
    %51 = arith.addf %48, %50 : vector<8x5xf32>
    %cst_30 = arith.constant 0.000000e+00 : f32
    %52 = vector.broadcast %cst_30 : f32 to vector<8x5xf32>
    %53 = arith.maximumf %51, %52 : vector<8x5xf32>
    %c0_31 = arith.constant 0 : index
    %c0_32 = arith.constant 0 : index
    %54 = vector.load %arg10[%c0_31, %c0_32] : memref<5x1xf32, #tpu.memory_space<vmem>>, vector<5x1xf32>
    %cst_33 = arith.constant dense<0.000000e+00> : vector<8x1xf32>
    %55 = tpu.matmul %53, %54, %cst_33 {dimension_numbers = #tpu.dot_dimension_numbers<[1], [0], [0], [1], [0, 0, 1, 1], [], []>} : vector<8x5xf32>, vector<5x1xf32>, vector<8x1xf32> -> vector<8x1xf32>
    %c0_34 = arith.constant 0 : index
    %c0_35 = arith.constant 0 : index
    %56 = vector.load %arg11[%c0_34, %c0_35] : memref<1x1xf32, #tpu.memory_space<vmem>>, vector<1x1xf32>
    %57 = vector.broadcast %56 : vector<1x1xf32> to vector<8x1xf32>
    %58 = arith.addf %55, %57 : vector<8x1xf32>
    %59 = vector.extract_strided_slice %58 {offsets = [0, 0], sizes = [4, 1], strides = [1, 1]} : vector<8x1xf32> to vector<4x1xf32>
    %60 = vector.extract_strided_slice %58 {offsets = [4, 0], sizes = [4, 1], strides = [1, 1]} : vector<8x1xf32> to vector<4x1xf32>
    %61 = arith.subf %59, %60 : vector<4x1xf32>
    %62 = arith.negf %61 : vector<4x1xf32>
    %63 = math.exp %62 : vector<4x1xf32>
    %cst_36 = arith.constant 1.000000e+00 : f32
    %64 = vector.broadcast %cst_36 : f32 to vector<4x1xf32>
    %65 = arith.addf %64, %63 : vector<4x1xf32>
    %66 = arith.divf %64, %65 : vector<4x1xf32>
    %67 = vector.shape_cast %66 : vector<4x1xf32> to vector<1x1x4xf32>
    %c0_37 = arith.constant 0 : index
    %c0_38 = arith.constant 0 : index
    %c0_39 = arith.constant 0 : index
    %68 = vector.load %arg12[%c0_37, %c0_38, %c0_39] : memref<1x1x4xf32, #tpu.memory_space<vmem>>, vector<1x1x4xf32>
    tpu.vector_store %arg12[%c0_37, %c0_38, %c0_39], %67 {strides = array<i32>} : memref<1x1x4xf32, #tpu.memory_space<vmem>>, vector<1x1x4xf32>,
    return
  }
  func.func @transform_0(%arg0: i32) -> (i32, i32, i32, i32) {
    %c0_i32 = arith.constant 0 : i32
    %c0_i32_0 = arith.constant 0 : i32
    %c0_i32_1 = arith.constant 0 : i32
    %c0_i32_2 = arith.constant 0 : i32
    return %c0_i32, %arg0, %c0_i32_0, %c0_i32_1 : i32, i32, i32, i32
  }
  func.func @transform_1(%arg0: i32) -> (i32, i32, i32, i32) {
    %c0_i32 = arith.constant 0 : i32
    %c0_i32_0 = arith.constant 0 : i32
    %c0_i32_1 = arith.constant 0 : i32
    %c0_i32_2 = arith.constant 0 : i32
    return %c0_i32, %arg0, %c0_i32_0, %c0_i32_1 : i32, i32, i32, i32
  }
  func.func @transform_2(%arg0: i32) -> (i32, i32) {
    %c0_i32 = arith.constant 0 : i32
    %c0_i32_0 = arith.constant 0 : i32
    %c0_i32_1 = arith.constant 0 : i32
    return %c0_i32, %c0_i32_0 : i32, i32
  }
  func.func @transform_3(%arg0: i32) -> (i32, i32) {
    %c0_i32 = arith.constant 0 : i32
    %c0_i32_0 = arith.constant 0 : i32
    %c0_i32_1 = arith.constant 0 : i32
    return %c0_i32, %c0_i32_0 : i32, i32
  }
  func.func @transform_4(%arg0: i32) -> (i32, i32) {
    %c0_i32 = arith.constant 0 : i32
    %c0_i32_0 = arith.constant 0 : i32
    %c0_i32_1 = arith.constant 0 : i32
    return %c0_i32, %c0_i32_0 : i32, i32
  }
  func.func @transform_5(%arg0: i32) -> (i32, i32) {
    %c0_i32 = arith.constant 0 : i32
    %c0_i32_0 = arith.constant 0 : i32
    %c0_i32_1 = arith.constant 0 : i32
    return %c0_i32, %c0_i32_0 : i32, i32
  }
  func.func @transform_6(%arg0: i32) -> (i32, i32) {
    %c0_i32 = arith.constant 0 : i32
    %c0_i32_0 = arith.constant 0 : i32
    %c0_i32_1 = arith.constant 0 : i32
    return %c0_i32, %c0_i32_0 : i32, i32
  }
  func.func @transform_7(%arg0: i32) -> (i32, i32) {
    %c0_i32 = arith.constant 0 : i32
    %c0_i32_0 = arith.constant 0 : i32
    %c0_i32_1 = arith.constant 0 : i32
    return %c0_i32, %c0_i32_0 : i32, i32
  }
  func.func @transform_8(%arg0: i32) -> (i32, i32) {
    %c0_i32 = arith.constant 0 : i32
    %c0_i32_0 = arith.constant 0 : i32
    %c0_i32_1 = arith.constant 0 : i32
    return %c0_i32, %c0_i32_0 : i32, i32
  }
  func.func @transform_9(%arg0: i32) -> (i32, i32) {
    %c0_i32 = arith.constant 0 : i32
    %c0_i32_0 = arith.constant 0 : i32
    %c0_i32_1 = arith.constant 0 : i32
    return %c0_i32, %c0_i32_0 : i32, i32
  }
  func.func @transform_10(%arg0: i32) -> (i32, i32) {
    %c0_i32 = arith.constant 0 : i32
    %c0_i32_0 = arith.constant 0 : i32
    %c0_i32_1 = arith.constant 0 : i32
    return %c0_i32, %c0_i32_0 : i32, i32
  }
  func.func @transform_11(%arg0: i32) -> (i32, i32, i32) {
    %c0_i32 = arith.constant 0 : i32
    %c0_i32_0 = arith.constant 0 : i32
    %c0_i32_1 = arith.constant 0 : i32
    return %arg0, %c0_i32, %c0_i32_0 : i32, i32, i32
  }
}

</mosaic_0001>

<bundles_post_ra>
// kernel: tpu_custom_call.1
= control target key start
LH: loop header
LB: loop body
LE: loop exit
PB: predicated region body
PF: predicated region fallthrough
CT: control target
= control target key end

     0   :  { %s4656_s0 = inlined_call_operand.vmem [shape: f32[2,8,8,32], index: 0, kind: input, shape index: {}]   ;;  %s4657_s1 = inlined_call_operand.vmem [shape: f32[2,8,32,16], index: 1, kind: input, shape index: {}]   ;;  %s4658_s2 = inlined_call_operand.vmem [shape: f32[21,1], index: 2, kind: input, shape index: {}]   ;;  %s4659_s3 = inlined_call_operand.vmem [shape: f32[21,1], index: 3, kind: input, shape index: {}]   ;;  %s4660_s4 = inlined_call_operand.vmem [shape: f32[128,8], index: 4, kind: input, shape index: {}]   ;;  %s4661_s5 = inlined_call_operand.vmem [shape: f32[21,10], index: 5, kind: input, shape index: {}]   ;;  %s4662_s6 = inlined_call_operand.vmem [shape: f32[1,10], index: 6, kind: input, shape index: {}]   ;;  %s4663_s7 = inlined_call_operand.vmem [shape: f32[10,5], index: 7, kind: input, shape index: {}]   ;;  %s4664_s8 = inlined_call_operand.vmem [shape: f32[1,5], index: 8, kind: input, shape index: {}]   ;;  %s4665_s9 = inlined_call_operand.vmem [shape: f32[5,1], index: 9, kind: input, shape index: {}]   ;;  %s4666_s10 = inlined_call_operand.<no memory space> [shape: f32[1,1], index: 10, kind: input, shape index: {}]   ;;  %s4667_s11 = inlined_call_operand.hbm [shape: f32[2,1,4], index: 11, kind: output, shape index: {}]  }
   0x1   :  { %v16_v0 = vstv %s4666_s10 }
   0x2   :  { %17 = vst [vmem:[#allocation2] sm:$0x1] %v16_v0 }
   0x3   :  { %18 = vsyncpa [#allocation6], 0 }
   0x4   :  { %20 = vsyncpa [#allocation6 + $0x1], 0  ;;  %s3177_s19 = smov 0   ;;  %s3179_s20 = smov 0  }
   0x5   :  { %s3181_s21 = smov 0   ;;  %s3183_s22 = smov 0  }
   0x6 LB: > { %s4668_s10 = sadd.s32 4294967295, %s3102_s22   ;;  %s2820_s23 = sadd.s32 4294967294, %s3102_s22   ;;  %s3102_s22 = sphi %s3183_s22, %s4694_s22   ;;  %s3098_s21 = sphi %s3181_s21, %s4693_s21   ;;  %s3094_s20 = sphi %s3179_s20, %s4692_s20   ;;  %s3090_s19 = sphi %s3177_s19, %s4691_s19  }
   0x7   : > { %s3200_s24 = sadd.s32 1, %s3102_s22   ;;  %s33_s25 = sadd.s32 1, %s3098_s21 }
   0x8   : > { %s30_s26 = ssub.s32 %s3102_s22, %s3200_s24  ;;  %p40_p0 = scmp.ne.s32.totalorder %s3098_s21, %s3094_s20 }
   0x9   : > { %p31_p1 = scmp.eq.s32.totalorder %s30_s26, 0  ;;  %p41_p2 = scmp.eq.s32.totalorder %s3102_s22, 0 }
   0xa   : > { %p285_p3 = scmp.eq.s32.totalorder %s4668_s10, 1  ;;  %p290_p4 = scmp.ne.s32.totalorder %s3094_s20, %s3090_s19 }
   0xb   : > { %s3213_s27 = scalar_select %p31_p1, %s3098_s21, %s33_s25  }
   0xc   : > { %p3215_p5 = por %p41_p2, %p40_p0  ;;  %p3219_p6 = por %p285_p3, %p40_p0 }
   0xd   : > { %p291_p7 = scmp.eq.s32.totalorder %s2820_s23, 1  ;;  %p2822_p9 = scmp.ge.s32.totalorder %s3102_s22, 2 }
   0xf   : > { %p3223_p8 = por %p291_p7, %p290_p4  ;;  %334 = sbr.rel (%p2822_p9) target bundleno = 68 (0x44), region = 52 }
  0x14   : > { %337 = sbr.rel (!%p3215_p5) target bundleno = 32 (0x20), region = 56  ;;  %s339_s12 = sand.u32 (%p3215_p5), 1, %s3098_s21  }
  0x15   : > { %s2850_s13 = sshll.u32 (%p3215_p5), %s3102_s22, 5  ;;  %s2823_s14 = sshll.u32 (%p3215_p5), %s339_s12, 6 }
  0x16   : > { %s344_s17 = scalar_lea.vmem (%p3215_p5), %s4656_s0, %s2850_s13  ;;  %s341_s18 = scalar_lea.vmem (%p3215_p5), [#allocation3], %s2823_s14 }
  0x17   : > { %v387_v1 = vld [vmem:[%s344_s17] sm:$0xff] (%p3215_p5)  ;;  %v389_v2 = vld [vmem:[%s344_s17 + $0x8] sm:$0xff] (%p3215_p5)  ;;  %v391_v3 = vld [vmem:[%s344_s17 + $0x10] sm:$0xff] (%p3215_p5) }
  0x18   : > { %388 = vst [vmem:[%s341_s18] sm:$0xff] (%p3215_p5), %v387_v1  ;;  %v393_v4 = vld [vmem:[%s344_s17 + $0x18] sm:$0xff] (%p3215_p5)  ;;  %v395_v5 = vld [vmem:[%s344_s17 + $0x40] sm:$0xff] (%p3215_p5)  ;;  %v397_v6 = vld [vmem:[%s344_s17 + $0x48] sm:$0xff] (%p3215_p5) }
  0x19   : > { %390 = vst [vmem:[%s341_s18 + $0x8] sm:$0xff] %v389_v2  ;;  %v399_v7 = vld [vmem:[%s344_s17 + $0x50] sm:$0xff]  ;;  %v401_v8 = vld [vmem:[%s344_s17 + $0x58] sm:$0xff] }
  0x1a   : > { %392 = vst [vmem:[%s341_s18 + $0x10] sm:$0xff] %v391_v3 }
  0x1b   : > { %394 = vst [vmem:[%s341_s18 + $0x18] sm:$0xff] %v393_v4 }
  0x1c   : > { %396 = vst [vmem:[%s341_s18 + $0x20] sm:$0xff] %v395_v5 }
  0x1d   : > { %398 = vst [vmem:[%s341_s18 + $0x28] sm:$0xff] %v397_v6 }
  0x1e   : > { %400 = vst [vmem:[%s341_s18 + $0x30] sm:$0xff] %v399_v7 }
  0x1f   : > { %402 = vst [vmem:[%s341_s18 + $0x38] sm:$0xff] %v401_v8 }
  0x20 PF: > { %408 = sbr.rel (!%p3215_p5) target bundleno = 68 (0x44), region = 94  ;;  %s410_s23 = sand.u32 (%p3215_p5), 1, %s3098_s21  }
  0x21   : > { %s2852_s25 = sshll.u32 (%p3215_p5), %s3102_s22, 7  ;;  %s2826_s26 = sshll.u32 (%p3215_p5), %s410_s23, 8 }
  0x22   : > { %s3244_s14 = scalar_lea.vmem (%p3215_p5), %s4657_s1, %s2852_s25  ;;  %s3249_s28 = scalar_lea.vmem (%p3215_p5), [#allocation4], %s2826_s26 }
  0x23   : > { %v507_v9 = vld [vmem:[%s3244_s14] sm:$0xff] (%p3215_p5)  ;;  %v509_v10 = vld [vmem:[%s3244_s14 + $0x8] sm:$0xff] (%p3215_p5)  ;;  %v511_v11 = vld [vmem:[%s3244_s14 + $0x10] sm:$0xff] (%p3215_p5) }
  0x24   : > { %508 = vst [vmem:[%s3249_s28] sm:$0xff] (%p3215_p5), %v507_v9  ;;  %v513_v12 = vld [vmem:[%s3244_s14 + $0x18] sm:$0xff] (%p3215_p5)  ;;  %v515_v13 = vld [vmem:[%s3244_s14 + $0x20] sm:$0xff] (%p3215_p5)  ;;  %v517_v14 = vld [vmem:[%s3244_s14 + $0x28] sm:$0xff] (%p3215_p5) }
  0x25   : > { %510 = vst [vmem:[%s3249_s28 + $0x8] sm:$0xff] %v509_v10  ;;  %v519_v15 = vld [vmem:[%s3244_s14 + $0x30] sm:$0xff]  ;;  %v521_v16 = vld [vmem:[%s3244_s14 + $0x38] sm:$0xff]  ;;  %v523_v17 = vld [vmem:[%s3244_s14 + $0x40] sm:$0xff] }
  0x26   : > { %512 = vst [vmem:[%s3249_s28 + $0x10] sm:$0xff] %v511_v11  ;;  %v525_v18 = vld [vmem:[%s3244_s14 + $0x48] sm:$0xff]  ;;  %v527_v19 = vld [vmem:[%s3244_s14 + $0x50] sm:$0xff]  ;;  %v529_v20 = vld [vmem:[%s3244_s14 + $0x58] sm:$0xff] }
  0x27   : > { %514 = vst [vmem:[%s3249_s28 + $0x18] sm:$0xff] %v513_v12  ;;  %v531_v21 = vld [vmem:[%s3244_s14 + $0x60] sm:$0xff]  ;;  %v533_v22 = vld [vmem:[%s3244_s14 + $0x68] sm:$0xff]  ;;  %v535_v23 = vld [vmem:[%s3244_s14 + $0x70] sm:$0xff] }
  0x28   : > { %516 = vst [vmem:[%s3249_s28 + $0x20] sm:$0xff] %v515_v13  ;;  %v537_v24 = vld [vmem:[%s3244_s14 + $0x78] sm:$0xff]  ;;  %v539_v25 = vld [vmem:[%s3244_s14 + $0x100] sm:$0xff]  ;;  %v541_v26 = vld [vmem:[%s3244_s14 + $0x108] sm:$0xff] }
  0x29   : > { %518 = vst [vmem:[%s3249_s28 + $0x28] sm:$0xff] %v517_v14  ;;  %v543_v27 = vld [vmem:[%s3244_s14 + $0x110] sm:$0xff]  ;;  %v545_v28 = vld [vmem:[%s3244_s14 + $0x118] sm:$0xff]  ;;  %v547_v29 = vld [vmem:[%s3244_s14 + $0x120] sm:$0xff] }
  0x2a   : > { %520 = vst [vmem:[%s3249_s28 + $0x30] sm:$0xff] %v519_v15  ;;  %v549_v30 = vld [vmem:[%s3244_s14 + $0x128] sm:$0xff]  ;;  %v551_v31 = vld [vmem:[%s3244_s14 + $0x130] sm:$0xff]  ;;  %v553_v32 = vld [vmem:[%s3244_s14 + $0x138] sm:$0xff] }
  0x2b   : > { %522 = vst [vmem:[%s3249_s28 + $0x38] sm:$0xff] %v521_v16  ;;  %v555_v33 = vld [vmem:[%s3244_s14 + $0x140] sm:$0xff]  ;;  %v557_v34 = vld [vmem:[%s3244_s14 + $0x148] sm:$0xff]  ;;  %v559_v35 = vld [vmem:[%s3244_s14 + $0x150] sm:$0xff] }
  0x2c   : > { %524 = vst [vmem:[%s3249_s28 + $0x40] sm:$0xff] %v523_v17  ;;  %v561_v36 = vld [vmem:[%s3244_s14 + $0x158] sm:$0xff]  ;;  %v563_v37 = vld [vmem:[%s3244_s14 + $0x160] sm:$0xff]  ;;  %v565_v38 = vld [vmem:[%s3244_s14 + $0x168] sm:$0xff] }
  0x2d   : > { %526 = vst [vmem:[%s3249_s28 + $0x48] sm:$0xff] %v525_v18  ;;  %v567_v39 = vld [vmem:[%s3244_s14 + $0x170] sm:$0xff]  ;;  %v569_v40 = vld [vmem:[%s3244_s14 + $0x178] sm:$0xff] }
  0x2e   : > { %528 = vst [vmem:[%s3249_s28 + $0x50] sm:$0xff] %v527_v19 }
  0x2f   : > { %530 = vst [vmem:[%s3249_s28 + $0x58] sm:$0xff] %v529_v20 }
  0x30   : > { %532 = vst [vmem:[%s3249_s28 + $0x60] sm:$0xff] %v531_v21 }
  0x31   : > { %534 = vst [vmem:[%s3249_s28 + $0x68] sm:$0xff] %v533_v22 }
  0x32   : > { %536 = vst [vmem:[%s3249_s28 + $0x70] sm:$0xff] %v535_v23 }
  0x33   : > { %538 = vst [vmem:[%s3249_s28 + $0x78] sm:$0xff] %v537_v24 }
  0x34   : > { %540 = vst [vmem:[%s3249_s28 + $0x80] sm:$0xff] %v539_v25 }
  0x35   : > { %542 = vst [vmem:[%s3249_s28 + $0x88] sm:$0xff] %v541_v26 }
  0x36   : > { %544 = vst [vmem:[%s3249_s28 + $0x90] sm:$0xff] %v543_v27 }
  0x37   : > { %546 = vst [vmem:[%s3249_s28 + $0x98] sm:$0xff] %v545_v28 }
  0x38   : > { %548 = vst [vmem:[%s3249_s28 + $0xa0] sm:$0xff] %v547_v29 }
  0x39   : > { %550 = vst [vmem:[%s3249_s28 + $0xa8] sm:$0xff] %v549_v30 }
  0x3a   : > { %552 = vst [vmem:[%s3249_s28 + $0xb0] sm:$0xff] %v551_v31 }
  0x3b   : > { %554 = vst [vmem:[%s3249_s28 + $0xb8] sm:$0xff] %v553_v32 }
  0x3c   : > { %556 = vst [vmem:[%s3249_s28 + $0xc0] sm:$0xff] %v555_v33 }
  0x3d   : > { %558 = vst [vmem:[%s3249_s28 + $0xc8] sm:$0xff] %v557_v34 }
  0x3e   : > { %560 = vst [vmem:[%s3249_s28 + $0xd0] sm:$0xff] %v559_v35 }
  0x3f   : > { %562 = vst [vmem:[%s3249_s28 + $0xd8] sm:$0xff] %v561_v36 }
  0x40   : > { %564 = vst [vmem:[%s3249_s28 + $0xe0] sm:$0xff] %v563_v37 }
  0x41   : > { %566 = vst [vmem:[%s3249_s28 + $0xe8] sm:$0xff] %v565_v38 }
  0x42   : > { %568 = vst [vmem:[%s3249_s28 + $0xf0] sm:$0xff] %v567_v39 }
  0x43   : > { %570 = vst [vmem:[%s3249_s28 + $0xf8] sm:$0xff] %v569_v40 }
  0x44 PF: > { %p2830_p10 = scmp.ge.s32.totalorder %s3102_s22, 1  ;;  %p575_p11 = scmp.lt.s32.totalorder %s3102_s22, 3 }
  0x46   : > { %p576_p12 = pnand %p2830_p10, %p575_p11 }
  0x47   : > { %s3315_s15 = sand.u32 (!%p576_p12), 1, %s3094_s20   ;;  %s3107_s12 = smov (!%p576_p12), 16  }
  0x48   : > { %579 = sbr.rel (%p576_p12) target bundleno = 1466 (0x5ba), region = 132  ;;  %s2831_s16 = sshll.u32 (!%p576_p12), %s3315_s15, 6 }
  0x49   : > { %s584_s17 = scalar_lea.vmem (!%p576_p12), [#allocation3], %s2831_s16  ;;  %s2832_s18 = sshll.u32 (!%p576_p12), %s3315_s15, 8 }
  0x4a   : > { %s3359_s23 = scalar_lea.vmem (!%p576_p12), [#allocation4], %s2832_s18  ;;  %s3108_s13 = smov (!%p576_p12), 32  }
  0x4b   : > { %s3109_s14 = smov (!%p576_p12), 64   ;;  %s3110_s28 = smov (!%p576_p12), 80  }
  0x4c   : > { %s3111_s16 = smov (!%p576_p12), 48   ;;  %s3113_s18 = smov (!%p576_p12), 112  }
  0x4d   : > { %v3318_v41 = vld [vmem:[%s584_s17] sm:$0xff]  ;;  %vm681_vm0 = vcmask 261120   ;;  %v3320_v42 = vld [vmem:[%s584_s17 + $0x10] sm:$0xff]  ;;  %v3328_v46 = vld [vmem:[%s584_s17 + $0x8] sm:$0xff]  ;;  %vm834_vm1 = vcmask 130048   ;;  %s4690_s25 = sadd.s32 4294967295, %s3102_s22  }
  0x4e   : > { %v673_v43 = vmul.f32 %v3318_v41, %v3318_v41  ;;  %v675_v44 = vmul.f32 %v3320_v42, %v3320_v42  ;;  %v3326_v45 = vld [vmem:[%s584_s17 + $0x30] sm:$0xff]  ;;  %v3330_v47 = vld [vmem:[%s584_s17 + $0x18] sm:$0xff]  ;;  %v674_v53 = vmul.f32 %v3328_v46, %v3328_v46  ;;  %v3347_v58 = vld [vmem:[%s584_s17 + $0x28] sm:$0xff]  ;;  %s3060_s26 = scalar_lea.hbm %s4667_s11, 2 }
  0x4f   : > { %v679_v48 = vmul.f32 %v3326_v45, %v3326_v45  ;;  %v3336_v51 = vld [vmem:[%s584_s17 + $0x38] sm:$0xff]  ;;  %v676_v54 = vmul.f32 %v3330_v47, %v3330_v47  ;;  %v3349_v59 = vld [vmem:[%s584_s17 + $0x20] sm:$0xff]  ;;  %v678_v61 = vmul.f32 %v3347_v58, %v3347_v58  ;;  %v3365_v2 = vld [vmem:[%s3359_s23 + $0x8] sm:$0xff]  ;;  %s3112_s17 = smov 96  }
  0x50   : > { %v682_v49 = vsel %vm681_vm0, %v673_v43, 0.0  ;;  %v688_v50 = vsel %vm681_vm0, %v675_v44, 0.0  ;;  %v680_v55 = vmul.f32 %v3336_v51, %v3336_v51  ;;  %v685_v56 = vsel %vm681_vm0, %v674_v53, 0.0  ;;  %v3362_v1 = vld [vmem:[%s3359_s23] sm:$0xff]  ;;  %v3372_v5 = vld [vmem:[%s3359_s23 + $0x10] sm:$0xff]  ;;  %v3382_v10 = vld [vmem:[%s3359_s23 + $0x48] sm:$0xff] }
  0x51   : > { %683 = vadd.xlane.f32.xlu1 %v682_v49  ;;  %689 = vadd.xlane.f32.xlu0 %v688_v50  ;;  %v700_v52 = vsel %vm681_vm0, %v679_v48, 0.0  ;;  %v691_v57 = vsel %vm681_vm0, %v676_v54, 0.0  ;;  %v677_v62 = vmul.f32 %v3349_v59, %v3349_v59  ;;  %v697_v63 = vsel %vm681_vm0, %v678_v61, 0.0  ;;  %v3379_v9 = vld [vmem:[%s3359_s23 + $0x40] sm:$0xff]  ;;  %v3385_v11 = vld [vmem:[%s3359_s23 + $0x18] sm:$0xff]  ;;  %v3395_v17 = vld [vmem:[%s3359_s23 + $0x50] sm:$0xff] }
  0x52   : > { %701 = vadd.xlane.f32.xlu2 %v700_v52  ;;  %v703_v60 = vsel %vm681_vm0, %v680_v55, 0.0  ;;  %v802_v3 = vmul.f32 %v3362_v1, %v3362_v1  ;;  %v803_v4 = vmul.f32 %v3365_v2, %v3365_v2  ;;  %v804_v6 = vmul.f32 %v3372_v5, %v3372_v5  ;;  %v3403_v23 = vld [vmem:[%s3359_s23 + $0x58] sm:$0xff]  ;;  %v3409_v28 = vld [vmem:[%s3359_s23 + $0x20] sm:$0xff]  ;;  %v3412_v29 = vld [vmem:[%s3359_s23 + $0x28] sm:$0xff] }
  0x53   : > { %v694_v0 = vsel %vm681_vm0, %v677_v62, 0.0  ;;  %v810_v13 = vmul.f32 %v3379_v9, %v3379_v9  ;;  %v811_v14 = vmul.f32 %v3382_v10, %v3382_v10  ;;  %v805_v15 = vmul.f32 %v3385_v11, %v3385_v11  ;;  %v3420_v35 = vld [vmem:[%s3359_s23 + $0x30] sm:$0xff]  ;;  %v3427_v40 = vld [vmem:[%s3359_s23 + $0x60] sm:$0xff]  ;;  %v3430_v43 = vld [vmem:[%s3359_s23 + $0x68] sm:$0xff] }
  0x54   : > { %v835_v7 = vsel %vm834_vm1, %v802_v3, 0.0  ;;  %v836_v8 = vsel %vm834_vm1, %v803_v4, 0.0  ;;  %v838_v16 = vsel %vm834_vm1, %v804_v6, 0.0  ;;  %v812_v19 = vmul.f32 %v3395_v17, %v3395_v17  ;;  %v3433_v48 = vld [vmem:[%s3359_s23 + $0x38] sm:$0xff] }
  0x55   : > { %v837_v12 = vadd.f32 %v836_v8, %v835_v7  ;;  %v861_v20 = vsel %vm834_vm1, %v810_v13, 0.0  ;;  %v862_v21 = vsel %vm834_vm1, %v811_v14, 0.0  ;;  %v840_v22 = vsel %vm834_vm1, %v805_v15, 0.0  ;;  %v3450_v3 = vld [vmem:[%s3359_s23 + $0x78] sm:$0xff] }
  0x56   : > { %v863_v24 = vadd.f32 %v862_v21, %v861_v20  ;;  %v813_v26 = vmul.f32 %v3403_v23, %v3403_v23  ;;  %v864_v27 = vsel %vm834_vm1, %v812_v19, 0.0  ;;  %v806_v31 = vmul.f32 %v3409_v28, %v3409_v28 }
  0x57   : > { %v839_v18 = vadd.f32 %v838_v16, %v837_v12  ;;  %v807_v32 = vmul.f32 %v3412_v29, %v3412_v29  ;;  %v808_v37 = vmul.f32 %v3420_v35, %v3420_v35  ;;  %v814_v50 = vmul.f32 %v3427_v40, %v3427_v40 }
  0x58   : > { %v865_v30 = vadd.f32 %v864_v27, %v863_v24  ;;  %v866_v34 = vsel %vm834_vm1, %v813_v26, 0.0  ;;  %v848_v38 = vsel %vm834_vm1, %v806_v31, 0.0  ;;  %v815_v52 = vmul.f32 %v3430_v43, %v3430_v43 }
  0x59   : > { %686 = vadd.xlane.f32.xlu1 %v685_v56  ;;  %692 = vadd.xlane.f32.xlu0 %v691_v57  ;;  %v841_v25 = vadd.f32 %v840_v22, %v839_v18  ;;  %v849_v39 = vsel %vm834_vm1, %v807_v32, 0.0  ;;  %v809_v54 = vmul.f32 %v3433_v48, %v3433_v48  ;;  %v851_v55 = vsel %vm834_vm1, %v808_v37, 0.0  ;;  %v3443_v56 = vld [vmem:[%s3359_s23 + $0x70] sm:$0xff]  ;;  %v3461_v37 = vld [vmem:[%s3359_s23 + $0xa8] sm:$0xff] }
  0x5a   : > { %704 = vadd.xlane.f32.xlu2 %v703_v60  ;;  %v867_v36 = vadd.f32 %v866_v34, %v865_v30  ;;  %v850_v49 = vadd.f32 %v849_v39, %v848_v38  ;;  %v816_v61 = vmul.f32 %v3443_v56, %v3443_v56  ;;  %v874_v62 = vsel %vm834_vm1, %v814_v50, 0.0  ;;  %v3468_v50 = vld [vmem:[%s3359_s23 + $0xb0] sm:$0xff] }
  0x5b   : > { %v842_v33 = vrot.slane %v841_v25, 4  ;;  %v875_v4 = vsel %vm834_vm1, %v815_v52, 0.0  ;;  %v817_v8 = vmul.f32 %v3450_v3, %v3450_v3 }
  0x5c   : > { %v868_v53 = vrot.slane %v867_v36, 4  ;;  %v852_v60 = vadd.f32 %v851_v55, %v850_v49  ;;  %v876_v12 = vadd.f32 %v875_v4, %v874_v62  ;;  %v877_v14 = vsel %vm834_vm1, %v816_v61, 0.0 }
  0x5d   : > { %v843_v44 = vadd.f32 %v842_v33, %v841_v25  ;;  %v879_v19 = vsel %vm834_vm1, %v817_v8, 0.0  ;;  %v823_v49 = vmul.f32 %v3461_v37, %v3461_v37 }
  0x5e   : > { %v878_v18 = vadd.f32 %v877_v14, %v876_v12 }
  0x5f   : > { %v844_v57 = vrot.slane %v843_v44, 2 }
  0x60   : > { %v880_v24 = vadd.f32 %v879_v19, %v878_v18 }
  0x61   : > { %698 = vadd.xlane.f32.xlu1 %v697_v63  ;;  %695 = vadd.xlane.f32.xlu0 %v694_v0  ;;  %v869_v63 = vadd.f32 %v868_v53, %v867_v36  ;;  %v853_v0 = vsel %vm834_vm1, %v809_v54, 0.0  ;;  %v845_v6 = vadd.f32 %v844_v57, %v843_v44  ;;  %v3458_v36 = vld [vmem:[%s3359_s23 + $0xa0] sm:$0xff]  ;;  %v824_v54 = vmul.f32 %v3468_v50, %v3468_v50  ;;  %v3474_v57 = vld [vmem:[%s3359_s23 + $0xb8] sm:$0xff] }
  0x62   : > { %v854_v7 = vadd.f32 %v853_v0, %v852_v60  ;;  %v881_v30 = vrot.slane %v880_v24, 4  ;;  %v822_v44 = vmul.f32 %v3458_v36, %v3458_v36  ;;  %v901_v60 = vsel %vm834_vm1, %v823_v49, 0.0 }
  0x63   : > { %v870_v13 = vrot.slane %v869_v63, 2  ;;  %v846_v15 = vrot.slane %v845_v6, 1  ;;  %v825_v0 = vmul.f32 %v3474_v57, %v3474_v57 }
  0x64   : > { %v855_v16 = vrot.slane %v854_v7, 4  ;;  %v882_v33 = vadd.f32 %v881_v30, %v880_v24  ;;  %v900_v55 = vsel %vm834_vm1, %v822_v44, 0.0 }
  0x65   : > { %v871_v20 = vadd.f32 %v870_v13, %v869_v63  ;;  %v847_v21 = vadd.f32 %v846_v15, %v845_v6  ;;  %v902_v4 = vadd.f32 %v901_v60, %v900_v55  ;;  %v905_v13 = vsel %vm834_vm1, %v825_v0, 0.0 }
  0x66   : > { %v856_v22 = vadd.f32 %v855_v16, %v854_v7  ;;  %v883_v39 = vrot.slane %v882_v33, 2  ;;  %v903_v7 = vsel %vm834_vm1, %v824_v54, 0.0 }
  0x67   : > { %v872_v25 = vrot.slane %v871_v20, 1  ;;  %v939_v26 = vmax.f32 %v847_v21, 1e-24  ;;  %v904_v12 = vadd.f32 %v903_v7, %v902_v4 }
  0x68   : > { %v857_v27 = vrot.slane %v856_v22, 2  ;;  %v884_v53 = vadd.f32 %v883_v39, %v882_v33 }
  0x69   : > { %v873_v31 = vadd.f32 %v872_v25, %v871_v20  ;;  %2908 = vrsqrt.f32 %v939_v26  ;;  %v906_v19 = vadd.f32 %v905_v13, %v904_v12  ;;  %vm953_vm2 = vweird.f32 %v939_v26 }
  0x6a   : > { %v858_v32 = vadd.f32 %v857_v27, %v856_v22  ;;  %v885_v63 = vrot.slane %v884_v53, 1 }
  0x6b   : > { %v941_v34 = vmax.f32 %v873_v31, 1e-24  ;;  %v907_v22 = vrot.slane %v906_v19, 4 }
  0x6c   : > { %v859_v38 = vrot.slane %v858_v32, 1  ;;  %v886_v8 = vadd.f32 %v885_v63, %v884_v53 }
  0x6d   : > { %2910 = vrsqrt.f32 %v941_v34  ;;  %v908_v30 = vadd.f32 %v907_v22, %v906_v19  ;;  %vm973_vm5 = vweird.f32 %v941_v34 }
  0x6e   : > { %v860_v52 = vadd.f32 %v859_v38, %v858_v32  ;;  %v942_v18 = vmax.f32 %v886_v8, 1e-24 }
  0x6f   : > { %v2909_v61 = vpop.eup %2908  ;;  %v909_v38 = vrot.slane %v908_v30, 2 }
  0x70   : > { %v940_v62 = vmax.f32 %v860_v52, 1e-24  ;;  %v948_v6 = vmul.f32 %v2909_v61, %v939_v26  ;;  %vm954_vm3 = vweird.f32 %v2909_v61  ;;  %vm983_vm11 = vweird.f32 %v942_v18 }
  0x71   : > { %vm955_vm4 = vmor %vm953_vm2, %vm954_vm3  ;;  %v910_v60 = vadd.f32 %v909_v38, %v908_v30  ;;  %v3525_v38 = vld [vmem:[%s3359_s23 + $0x88] sm:$0xff] }
  0x72   : > { %2912 = vrsqrt.f32 %v940_v62  ;;  %v949_v15 = vmul.f32 %v2909_v61, %v948_v6  ;;  %vm963_vm8 = vweird.f32 %v940_v62 }
  0x73   : > { %v2911_v14 = vpop.eup %2910  ;;  %2914 = vrsqrt.f32 %v942_v18 }
  0x74   : > { %v968_v16 = vmul.f32 %v2911_v14, %v941_v34  ;;  %v950_v20 = vmul.f32 0.5, %v949_v15  ;;  %vm974_vm6 = vweird.f32 %v2911_v14  ;;  %v3496_v15 = vld [vmem:[%s3359_s23 + $0xc8] sm:$0xff] }
  0x75   : > { %vm975_vm7 = vmor %vm973_vm5, %vm974_vm6 }
  0x76   : > { %v969_v21 = vmul.f32 %v2911_v14, %v968_v16  ;;  %v951_v24 = vsub.f32 1.5, %v950_v20 }
  0x78   : > { %v2913_v25 = vpop.eup %2912  ;;  %v970_v27 = vmul.f32 0.5, %v969_v21  ;;  %v952_v31 = vmul.f32 %v2909_v61, %v951_v24 }
  0x79   : > { %v958_v32 = vmul.f32 %v2913_v25, %v940_v62  ;;  %v2915_v49 = vpop.eup %2914  ;;  %vm964_vm9 = vweird.f32 %v2913_v25  ;;  %v3493_v62 = vld [vmem:[%s3359_s23 + $0xc0] sm:$0xff] }
  0x7a   : > { %v971_v33 = vsub.f32 1.5, %v970_v27  ;;  %v956_v39 = vsel %vm955_vm4, %v2909_v61, %v952_v31  ;;  %v978_v55 = vmul.f32 %v2915_v49, %v942_v18  ;;  %v911_v61 = vrot.slane %v910_v60, 1  ;;  %vm965_vm10 = vmor %vm963_vm8, %vm964_vm9 }
  0x7b   : > { %v959_v44 = vmul.f32 %v2913_v25, %v958_v32  ;;  %v1030_v52 = vmul.f32 %v956_v39, %v3385_v11  ;;  %v1029_v26 = vmul.f32 %v956_v39, %v3372_v5  ;;  %v1028_v7 = vmul.f32 %v956_v39, %v3365_v2 }
  0x7c   : > { %v972_v53 = vmul.f32 %v2911_v14, %v971_v33  ;;  %v979_v6 = vmul.f32 %v2915_v49, %v978_v55  ;;  %v1027_v8 = vmul.f32 %v956_v39, %v3362_v1  ;;  %vm984_vm12 = vweird.f32 %v2915_v49  ;;  %v3522_v33 = vld [vmem:[%s3359_s23 + $0x80] sm:$0xff] }
  0x7d   : > { %v960_v54 = vmul.f32 0.5, %v959_v44  ;;  %1074 = vmatpush.msra.mxu0 %v1030_v52  ;;  %vm985_vm13 = vmor %vm983_vm11, %vm984_vm12  ;;  %v827_v18 = vmul.f32 %v3496_v15, %v3496_v15 }
  0x7e   : > { %v976_v63 = vsel %vm975_vm7, %v2911_v14, %v972_v53  ;;  %v980_v5 = vmul.f32 0.5, %v979_v6 }
  0x7f   : > { %v1038_v0 = vmul.f32 %v976_v63, %v3403_v23  ;;  %v961_v4 = vsub.f32 1.5, %v960_v54  ;;  %1075 = vmatpush.msra.mxu0 %v1029_v26  ;;  %v1037_v11 = vmul.f32 %v976_v63, %v3395_v17  ;;  %v912_v23 = vadd.f32 %v911_v61, %v910_v60 }
  0x80   : > { %v1036_v12 = vmul.f32 %v976_v63, %v3382_v10  ;;  %v981_v14 = vsub.f32 1.5, %v980_v5  ;;  %v1035_v17 = vmul.f32 %v976_v63, %v3379_v9  ;;  %v3505_v9 = vld [vmem:[%s3359_s23 + $0xd0] sm:$0xff]  ;;  %v914_v27 = vsel %vm834_vm1, %v827_v18, 0.0 }
  0x81   : > { %1120 = vmatpush.msra.mxu2 %v1038_v0  ;;  %v962_v34 = vmul.f32 %v2913_v25, %v961_v4  ;;  %1076 = vmatpush.msra.mxu0 %v1028_v7  ;;  %v3490_v1 = vmax.f32 %v912_v23, 1e-24  ;;  %v3543_v4 = vld [vmem:[%s3359_s23 + $0x98] sm:$0xff] }
  0x82   : > { %v982_v16 = vmul.f32 %v2915_v49, %v981_v14  ;;  %v821_v7 = vmul.f32 %v3543_v4, %v3543_v4 }
  0x83   : > { %1121 = vmatpush.msra.mxu2 %v1037_v11  ;;  %v966_v13 = vsel %vm965_vm10, %v2913_v25, %v962_v34  ;;  %1077 = vmatpush.msra.mxu0 %v1027_v8  ;;  %2916 = vrsqrt.f32 %v3490_v1  ;;  %v3514_v25 = vld [vmem:[%s3359_s23 + $0xd8] sm:$0xff]  ;;  %vm1003_vm14 = vweird.f32 %v3490_v1 }
  0x84   : > { %v1034_v2 = vmul.f32 %v966_v13, %v3433_v48  ;;  %v1033_v10 = vmul.f32 %v966_v13, %v3420_v35  ;;  %v826_v48 = vmul.f32 %v3493_v62, %v3493_v62  ;;  %v986_v19 = vsel %vm985_vm13, %v2915_v49, %v982_v16  ;;  %v3534_v49 = vld [vmem:[%s3359_s23 + $0x90] sm:$0xff] }
  0x85   : > { %1122 = vmatpush.msra.mxu2 %v1036_v12  ;;  %v1032_v20 = vmul.f32 %v966_v13, %v3412_v29  ;;  %v828_v35 = vmul.f32 %v3505_v9, %v3505_v9  ;;  %v1042_v22 = vmul.f32 %v986_v19, %v3450_v3  ;;  %v1041_v24 = vmul.f32 %v986_v19, %v3443_v56  ;;  %v3555_v12 = vld [vmem:[%s3359_s23 + $0xe0] sm:$0xff]  ;;  %v3563_v16 = vld [vmem:[%s3359_s23 + $0xf0] sm:$0xff] }
  0x86   : > { %1097 = vmatpush.msra.mxu1 %v1034_v2  ;;  %v913_v21 = vsel %vm834_vm1, %v826_v48, 0.0  ;;  %v1031_v30 = vmul.f32 %v966_v13, %v3409_v28  ;;  %v829_v29 = vmul.f32 %v3514_v25, %v3514_v25  ;;  %v1040_v56 = vmul.f32 %v986_v19, %v3430_v43  ;;  %v3558_v13 = vld [vmem:[%s3359_s23 + $0xe8] sm:$0xff] }
  0x87   : > { %1123 = vmatpush.msra.mxu2 %v1035_v17  ;;  %v915_v31 = vadd.f32 %v914_v27, %v913_v21  ;;  %v916_v32 = vsel %vm834_vm1, %v828_v35, 0.0  ;;  %1143 = vmatpush.msra.mxu3 %v1042_v22  ;;  %v818_v3 = vmul.f32 %v3522_v33, %v3522_v33  ;;  %v819_v28 = vmul.f32 %v3525_v38, %v3525_v38 }
  0x88   : > { %1098 = vmatpush.msra.mxu1 %v1033_v10  ;;  %v918_v44 = vsel %vm834_vm1, %v829_v29, 0.0  ;;  %v1039_v53 = vmul.f32 %v986_v19, %v3427_v40  ;;  %v820_v43 = vmul.f32 %v3534_v49, %v3534_v49  ;;  %v892_v23 = vsel %vm834_vm1, %v821_v7, 0.0 }
  0x89   : > { %v917_v39 = vadd.f32 %v916_v32, %v915_v31  ;;  %v2917_v52 = vpop.eup %2916  ;;  %1144 = vmatpush.msra.mxu3 %v1041_v24  ;;  %v887_v54 = vsel %vm834_vm1, %v818_v3, 0.0  ;;  %v888_v55 = vsel %vm834_vm1, %v819_v28, 0.0  ;;  %v830_v48 = vmul.f32 %v3555_v12, %v3555_v12 }
  0x8a   : > { %1099 = vmatpush.msra.mxu1 %v1032_v20  ;;  %v998_v63 = vmul.f32 %v2917_v52, %v3490_v1  ;;  %v889_v6 = vadd.f32 %v888_v55, %v887_v54  ;;  %v890_v11 = vsel %vm834_vm1, %v820_v43, 0.0  ;;  %vm1004_vm15 = vweird.f32 %v2917_v52 }
  0x8b   : > { %v919_v0 = vadd.f32 %v918_v44, %v917_v39  ;;  %1145 = vmatpush.msra.mxu3 %v1040_v56  ;;  %v831_v18 = vmul.f32 %v3558_v13, %v3558_v13  ;;  %vm1005_vm2 = vmor %vm1003_vm14, %vm1004_vm15  ;;  %v832_v29 = vmul.f32 %v3563_v16, %v3563_v16  ;;  %v926_v3 = vsel %vm834_vm1, %v830_v48, 0.0 }
  0x8c   : > { %1100 = vmatpush.msra.mxu1 %v1031_v30  ;;  %v999_v34 = vmul.f32 %v2917_v52, %v998_v63  ;;  %v891_v5 = vadd.f32 %v890_v11, %v889_v6 }
  0x8d   : > { %v920_v8 = vrot.slane %v919_v0, 4  ;;  %1146 = vmatpush.msra.mxu3 %v1039_v53  ;;  %v927_v28 = vsel %vm834_vm1, %v831_v18, 0.0  ;;  %v929_v7 = vsel %vm834_vm1, %v832_v29, 0.0 }
  0x8e   : > { %v1000_v2 = vmul.f32 0.5, %v999_v34  ;;  %v893_v17 = vadd.f32 %v892_v23, %v891_v5  ;;  %v928_v6 = vadd.f32 %v927_v28, %v926_v3 }
  0x8f   : > { %v921_v14 = vadd.f32 %v920_v8, %v919_v0  ;;  %v3592_v0 = vld [vmem:[%s3359_s23 + $0xf8] sm:$0xff] }
  0x90   : > { %v1001_v10 = vsub.f32 1.5, %v1000_v2  ;;  %v894_v20 = vrot.slane %v893_v17, 4 }
  0x91   : > { %v922_v19 = vrot.slane %v921_v14, 2 }
  0x92   : > { %v1002_v22 = vmul.f32 %v2917_v52, %v1001_v10  ;;  %v895_v53 = vadd.f32 %v894_v20, %v893_v17  ;;  %v833_v17 = vmul.f32 %v3592_v0, %v3592_v0 }
  0x93   : > { %v923_v44 = vadd.f32 %v922_v19, %v921_v14  ;;  %v930_v19 = vadd.f32 %v929_v7, %v928_v6 }
  0x94   : > { %v1006_v56 = vsel %vm1005_vm2, %v2917_v52, %v1002_v22  ;;  %v896_v34 = vrot.slane %v895_v53, 2  ;;  %v931_v3 = vsel %vm834_vm1, %v833_v17, 0.0 }
  0x95   : > { %v1050_v54 = vmul.f32 %v1006_v56, %v3474_v57  ;;  %v1048_v63 = vmul.f32 %v1006_v56, %v3461_v37  ;;  %v924_v57 = vrot.slane %v923_v44, 1 }
  0x97   : > { %1189 = vmatpush.msrb.mxu1 %v1050_v54 }
  0xc4   : > { %v684_v60 = vpop.xlane.xlu1 %683  ;;  %v690_v26 = vpop.xlane.xlu0 %689 }
  0xc5   : > { %v3545_v61 = vmax.f32 %v684_v60, 1e-24  ;;  %v3547_v40 = vmax.f32 %v690_v26, 1e-24  ;;  %v702_v30 = vpop.xlane.xlu2 %701  ;;  %v1049_v60 = vmul.f32 %v1006_v56, %v3468_v50  ;;  %v1047_v50 = vmul.f32 %v1006_v56, %v3458_v36 }
  0xc6   : > { %v3585_v55 = vmax.f32 %v702_v30, 1e-24 }
  0xc7   : > { %2918 = vrsqrt.f32 %v3545_v61  ;;  %vm740_vm3 = vweird.f32 %v3547_v40  ;;  %1190 = vmatpush.msrb.mxu1 %v1049_v60  ;;  %vm720_vm6 = vweird.f32 %v3545_v61 }
  0xc8   : > { %2920 = vrsqrt.f32 %v3547_v40 }
  0xc9   : > { %1191 = vmatpush.msrb.mxu1 %v1048_v63 }
  0xcb   : > { %1192 = vmatpush.msrb.mxu1 %v1047_v50 }
  0xcc   : > { %v687_v35 = vpop.xlane.xlu1 %686  ;;  %v693_v21 = vpop.xlane.xlu0 %692 }
  0xcd   : > { %v2919_v24 = vpop.eup %2918  ;;  %v3569_v1 = vmax.f32 %v687_v35, 1e-24  ;;  %v3571_v27 = vmax.f32 %v693_v21, 1e-24  ;;  %v925_v35 = vadd.f32 %v924_v57, %v923_v44  ;;  %v897_v21 = vadd.f32 %v896_v34, %v895_v53  ;;  %v705_v7 = vpop.xlane.xlu2 %704 }
  0xce   : > { %v3575_v31 = vpop.eup %2920  ;;  %v715_v32 = vmul.f32 %v2919_v24, %v3545_v61  ;;  %vm721_vm4 = vweird.f32 %v2919_v24 }
  0xcf   : > { %v735_v39 = vmul.f32 %v3575_v31, %v3547_v40  ;;  %2922 = vrsqrt.f32 %v3569_v1  ;;  %vm741_vm5 = vweird.f32 %v3575_v31  ;;  %vm3604_vm7 = vmor %vm720_vm6, %vm721_vm4  ;;  %vm750_vm10 = vweird.f32 %v3571_v27 }
  0xd0   : > { %v716_v43 = vmul.f32 %v2919_v24, %v715_v32  ;;  %2924 = vrsqrt.f32 %v3571_v27  ;;  %vm3613_vm8 = vmor %vm740_vm3, %vm741_vm5  ;;  %v898_v54 = vrot.slane %v897_v21, 1  ;;  %vm730_vm12 = vweird.f32 %v3569_v1 }
  0xd1   : > { %v736_v52 = vmul.f32 %v3575_v31, %v735_v39  ;;  %2926 = vrsqrt.f32 %v3585_v55  ;;  %vm780_vm6 = vweird.f32 %v3585_v55 }
  0xd2   : > { %v717_v26 = vmul.f32 0.5, %v716_v43  ;;  %v945_v43 = vmax.f32 %v925_v35, 1e-24  ;;  %v899_v57 = vadd.f32 %v898_v54, %v897_v21 }
  0xd3   : > { %v737_v11 = vmul.f32 0.5, %v736_v52  ;;  %v932_v52 = vadd.f32 %v931_v3, %v930_v19 }
  0xd4   : > { %v718_v8 = vsub.f32 1.5, %v717_v26  ;;  %v699_v5 = vpop.xlane.xlu1 %698  ;;  %v696_v14 = vpop.xlane.xlu0 %695  ;;  %vm1013_vm4 = vweird.f32 %v945_v43 }
  0xd5   : > { %v2923_v23 = vpop.eup %2922  ;;  %v738_v37 = vsub.f32 1.5, %v737_v11  ;;  %v3599_v2 = vmax.f32 %v699_v5, 1e-24  ;;  %v3622_v32 = vmax.f32 %v696_v14, 1e-24  ;;  %v933_v34 = vrot.slane %v932_v52, 4 }
  0xd6   : > { %v2925_v10 = vpop.eup %2924  ;;  %v725_v36 = vmul.f32 %v2923_v23, %v3569_v1  ;;  %v719_v18 = vmul.f32 %v2919_v24, %v718_v8  ;;  %vm731_vm9 = vweird.f32 %v2923_v23 }
  0xd7   : > { %v745_v20 = vmul.f32 %v2925_v10, %v3571_v27  ;;  %2928 = vrsqrt.f32 %v3599_v2  ;;  %v739_v29 = vmul.f32 %v3575_v31, %v738_v37  ;;  %v3626_v28 = vpop.eup %2926  ;;  %vm751_vm11 = vweird.f32 %v2925_v10  ;;  %vm732_vm14 = vmor %vm730_vm12, %vm731_vm9 }
  0xd8   : > { %v726_v22 = vmul.f32 %v2923_v23, %v725_v36  ;;  %v723_v30 = vsel %vm3604_vm7, %v2919_v24, %v719_v18  ;;  %2930 = vrsqrt.f32 %v3622_v32  ;;  %v775_v63 = vmul.f32 %v3626_v28, %v3585_v55  ;;  %vm3641_vm13 = vmor %vm750_vm10, %vm751_vm11 }
  0xd9   : > { %v746_v40 = vmul.f32 %v2925_v10, %v745_v20  ;;  %v794_v56 = vmul.f32 %v723_v30, %v3318_v41  ;;  %v743_v24 = vsel %vm3613_vm8, %v3575_v31, %v739_v29  ;;  %2932 = vrsqrt.f32 %v945_v43 }
  0xda   : > { %v727_v39 = vmul.f32 0.5, %v726_v22  ;;  %v796_v53 = vmul.f32 %v743_v24, %v3320_v42  ;;  %v776_v27 = vmul.f32 %v3626_v28, %v775_v63  ;;  %v3651_v37 = vmax.f32 %v705_v7, 1e-24 }
  0xdb   : > { %v747_v44 = vmul.f32 0.5, %v746_v40  ;;  %2833 = vmatmul.msk.f32.vlgmr.msra.gmra.mxu0 %vm681_vm0, %v794_v56  ;;  %vm770_vm15 = vweird.f32 %v3599_v2  ;;  %vm781_vm7 = vweird.f32 %v3626_v28  ;;  %vm760_vm12 = vweird.f32 %v3622_v32 }
  0xdc   : > { %v728_v41 = vsub.f32 1.5, %v727_v39  ;;  %2835 = vmatmul.msk.f32.vlgmr.msra.gmra.mxu2 %vm681_vm0, %v796_v53  ;;  %v777_v19 = vmul.f32 0.5, %v776_v27  ;;  %v1833_v53 = vld [vmem:[%s4658_s2] sm:$0xff]  ;;  %vm3691_vm9 = vmor %vm780_vm6, %vm781_vm7 }
  0xdd   : > { %v2929_v60 = vpop.eup %2928  ;;  %v748_v26 = vsub.f32 1.5, %v747_v44 }
  0xde   : > { %v765_v31 = vmul.f32 %v2929_v60, %v3599_v2  ;;  %v729_v6 = vmul.f32 %v2923_v23, %v728_v41  ;;  %v3653_v14 = vpop.eup %2930  ;;  %vm771_vm2 = vweird.f32 %v2929_v60  ;;  %v778_v29 = vsub.f32 1.5, %v777_v19 }
  0xdf   : > { %v749_v11 = vmul.f32 %v2925_v10, %v748_v26  ;;  %v2933_v36 = vpop.eup %2932  ;;  %vm772_vm3 = vmor %vm770_vm15, %vm771_vm2  ;;  %v755_v61 = vmul.f32 %v3653_v14, %v3622_v32 }
  0xe0   : > { %v766_v8 = vmul.f32 %v2929_v60, %v765_v31  ;;  %v733_v5 = vsel %vm732_vm14, %v2923_v23, %v729_v6  ;;  %v3658_v23 = vmax.f32 %v899_v57, 1e-24  ;;  %vm1014_vm5 = vweird.f32 %v2933_v36 }
  0xe1   : > { %v795_v50 = vmul.f32 %v733_v5, %v3328_v46  ;;  %v753_v1 = vsel %vm3641_vm13, %v2925_v10, %v749_v11  ;;  %v934_v46 = vadd.f32 %v933_v34, %v932_v52  ;;  %v1008_v10 = vmul.f32 %v2933_v36, %v945_v43  ;;  %vm3670_vm8 = vmor %vm1013_vm4, %vm1014_vm5 }
  0xe2   : > { %v767_v17 = vmul.f32 0.5, %v766_v8  ;;  %v797_v48 = vmul.f32 %v753_v1, %v3330_v47  ;;  %2934 = vrsqrt.f32 %v3658_v23  ;;  %v756_v40 = vmul.f32 %v3653_v14, %v755_v61 }
  0xe3   : > { %2834 = vmatmul.msk.f32.vlgmr.msra.gmra.mxu1 %vm681_vm0, %v795_v50  ;;  %v935_v2 = vrot.slane %v934_v46, 2  ;;  %2936 = vrsqrt.f32 %v3651_v37  ;;  %v1009_v47 = vmul.f32 %v2933_v36, %v1008_v10  ;;  %v3104_v52 = vmov 0  }
  0xe4   : > { %v768_v18 = vsub.f32 1.5, %v767_v17  ;;  %2836 = vmatmul.msk.f32.vlgmr.msra.gmra.mxu3 %vm681_vm0, %v797_v48  ;;  %2903 = vset.pattern.permute.xlu1 %v3104_v52  ;;  %v779_v26 = vmul.f32 %v3626_v28, %v778_v29  ;;  %v757_v63 = vmul.f32 0.5, %v756_v40  ;;  %vm993_vm10 = vweird.f32 %v3658_v23 }
  0xe5   : > { %v936_v35 = vadd.f32 %v935_v2, %v934_v46  ;;  %v1010_v22 = vmul.f32 0.5, %v1009_v47  ;;  %2902 = vset.pattern.permute.xlu0 %v3104_v52  ;;  %2904 = vset.pattern.permute.xlu2 %v3104_v52  ;;  %vm761_vm13 = vweird.f32 %v3653_v14  ;;  %v1909_v2 = vld [vmem:[%s4659_s3 + $0x10] sm:$0x1f]  ;;  %vm790_vm4 = vweird.f32 %v3651_v37 }
  0xe6   : > { %v769_v20 = vmul.f32 %v2929_v60, %v768_v18  ;;  %1846 = vperm.xlu0 %2902, %v1833_v53   ;;  %v783_v55 = vsel %vm3691_vm9, %v3626_v28, %v779_v26  ;;  %v758_v5 = vsub.f32 1.5, %v757_v63  ;;  %v1834_v28 = vld [vmem:[%s4658_s2 + $0x8] sm:$0xff]  ;;  %vm3718_vm15 = vmor %vm760_vm12, %vm761_vm13  ;;  %v3105_v40 = vmov 1983009808  }
  0xe7   : > { %v937_v56 = vrot.slane %v936_v35, 1  ;;  %v1011_v3 = vsub.f32 1.5, %v1010_v22  ;;  %v800_v17 = vmul.f32 %v783_v55, %v3326_v45  ;;  %vm1788_vm9 = vcmask 392192  }
  0xe8   : > { %v773_v21 = vsel %vm772_vm3, %v2929_v60, %v769_v20  ;;  %v2935_v39 = vpop.eup %2934  ;;  %v1908_v60 = vld [vmem:[%s4659_s3 + $0x8] sm:$0xff]  ;;  %v759_v48 = vmul.f32 %v3653_v14, %v758_v5  ;;  %vm1815_vm12 = vcmask 785408   ;;  %vm1824_vm13 = vcmask 916480  }
  0xe9   : > { %v799_v30 = vmul.f32 %v773_v21, %v3347_v58  ;;  %v938_v44 = vadd.f32 %v937_v56, %v936_v35  ;;  %v1907_v58 = vld [vmem:[%s4659_s3] sm:$0xff]  ;;  %v3680_v43 = vpop.eup %2936  ;;  %v1012_v41 = vmul.f32 %v2933_v36, %v1011_v3  ;;  %v988_v54 = vmul.f32 %v2935_v39, %v3658_v23  ;;  %1917 = vperm.xlu2 %2904, %v1908_v60  }
  0xea   : > { %1912 = vperm.xlu1 %2903, %v1907_v58   ;;  %v785_v11 = vmul.f32 %v3680_v43, %v3651_v37  ;;  %vm994_vm11 = vweird.f32 %v2935_v39  ;;  %v763_v45 = vsel %vm3718_vm15, %v3653_v14, %v759_v48  ;;  %vm791_vm5 = vweird.f32 %v3680_v43 }
  0xeb   : > { %2838 = vmatmul.msk.f32.vlgmr.msrb.gmra.mxu1 %vm681_vm0, %v799_v30  ;;  %v946_v42 = vmax.f32 %v938_v44, 1e-24  ;;  %v1016_v6 = vsel %vm3670_vm8, %v2933_v36, %v1012_v41  ;;  %v989_v7 = vmul.f32 %v2935_v39, %v988_v54  ;;  %vm995_vm14 = vmor %vm993_vm10, %vm994_vm11  ;;  %v798_v47 = vmul.f32 %v763_v45, %v3349_v59 }
  0xec   : > { %v1054_v57 = vmul.f32 %v1016_v6, %v3514_v25  ;;  %v1053_v34 = vmul.f32 %v1016_v6, %v3505_v9  ;;  %v1052_v50 = vmul.f32 %v1016_v6, %v3496_v15  ;;  %v1835_v25 = vld [vmem:[%s4658_s2 + $0x10] sm:$0x1f]  ;;  %v1051_v9 = vmul.f32 %v1016_v6, %v3493_v62  ;;  %vm792_vm7 = vmor %vm790_vm4, %vm791_vm5 }
  0xed   : > { %v990_v8 = vmul.f32 0.5, %v989_v7  ;;  %2938 = vrsqrt.f32 %v946_v42  ;;  %v786_v27 = vmul.f32 %v3680_v43, %v785_v11  ;;  %vm1023_vm2 = vweird.f32 %v946_v42 }
  0xee   : > { %1212 = vmatpush.msrb.mxu2 %v1054_v57  ;;  %1851 = vperm.xlu0 %2902, %v1834_v28   ;;  %v1247_v56 = vunpack.c.l.s4 %v3105_v40  ;;  %v3106_v3 = vmov 1934713408   ;;  %vm1244_vm8 = vcmask 1047556   ;;  %vm1797_vm10 = vcmask 523264  }
  0xef   : > { %v991_v1 = vsub.f32 1.5, %v990_v8  ;;  %v787_v10 = vmul.f32 0.5, %v786_v27  ;;  %vm1806_vm11 = vcmask 654336  }
  0xf0   : > { %1213 = vmatpush.msrb.mxu2 %v1053_v34 }
  0xf1   : > { %v992_v15 = vmul.f32 %v2935_v39, %v991_v1  ;;  %v788_v20 = vsub.f32 1.5, %v787_v10 }
  0xf2   : > { %1214 = vmatpush.msrb.mxu2 %v1052_v50  ;;  %1856 = vperm.xlu1 %2903, %v1835_v25  }
  0xf3   : > { %v2939_v32 = vpop.eup %2938  ;;  %v996_v23 = vsel %vm995_vm14, %v2935_v39, %v992_v15  ;;  %v789_v14 = vmul.f32 %v3680_v43, %v788_v20  ;;  %v3745_v39 = vunpack.c.0.s8 %v1247_v56  ;;  %vm2444_vm14 = vcmask 61440  }
  0xf4   : > { %v1046_v62 = vmul.f32 %v996_v23, %v3543_v4  ;;  %1215 = vmatpush.msrb.mxu2 %v1051_v9  ;;  %v1045_v46 = vmul.f32 %v996_v23, %v3534_v49  ;;  %v1018_v18 = vmul.f32 %v2939_v32, %v946_v42  ;;  %v1044_v61 = vmul.f32 %v996_v23, %v3525_v38 }
  0xf5   : > { %2839 = vmatmul.msk.f32.vlgmr.msrb.gmra.mxu2 %vm681_vm0, %v800_v17  ;;  %vm1024_vm3 = vweird.f32 %v2939_v32  ;;  %v1043_v49 = vmul.f32 %v996_v23, %v3522_v33  ;;  %v793_v22 = vsel %vm792_vm7, %v3680_v43, %v789_v14 }
  0xf6   : > { %1166 = vmatpush.msrb.mxu0 %v1046_v62  ;;  %v1019_v19 = vmul.f32 %v2939_v32, %v1018_v18  ;;  %vm1025_vm6 = vmor %vm1023_vm2, %vm1024_vm3  ;;  %v801_v29 = vmul.f32 %v793_v22, %v3336_v51 }
  0xf8   : > { %1167 = vmatpush.msrb.mxu0 %v1045_v46  ;;  %v1020_v4 = vmul.f32 0.5, %v1019_v19 }
  0xfa   : > { %v1021_v35 = vsub.f32 1.5, %v1020_v4  ;;  %1168 = vmatpush.msrb.mxu0 %v1044_v61  ;;  %1922 = vperm.xlu1 %2903, %v1909_v2  }
  0xfc   : > { %v1022_v38 = vmul.f32 %v2939_v32, %v1021_v35  ;;  %1169 = vmatpush.msrb.mxu0 %v1043_v49 }
  0xfd   : > { %2837 = vmatmul.msk.f32.vlgmr.msrb.gmra.mxu0 %vm681_vm0, %v798_v47 }
  0xfe   : > { %v1026_v21 = vsel %vm1025_vm6, %v2939_v32, %v1022_v38 }
  0xff   : > { %v1058_v33 = vmul.f32 %v1026_v21, %v3592_v0  ;;  %v1057_v59 = vmul.f32 %v1026_v21, %v3563_v16  ;;  %v1056_v37 = vmul.f32 %v1026_v21, %v3558_v13  ;;  %v1055_v30 = vmul.f32 %v1026_v21, %v3555_v12 }
 0x100   : > { %v1257_v0 = vunpack.c.l.s4 %v3106_v3 }
 0x101   : > { %1235 = vmatpush.msrb.mxu3 %v1058_v33 }
 0x102   : > { %v3747_v16 = vunpack.c.0.s8 %v1257_v0 }
 0x103   : > { %1236 = vmatpush.msrb.mxu3 %v1057_v59 }
 0x105   : > { %1237 = vmatpush.msrb.mxu3 %v1056_v37 }
 0x107   : > { %1238 = vmatpush.msrb.mxu3 %v1055_v30 }
 0x108   : > { %2840 = vmatmul.msk.f32.vlgmr.msrb.gmra.mxu3 %vm681_vm0, %v801_v29 }
 0x158   : > { %v1079_v24 = vpop.f32.mrf.mxu0 }
 0x159   : > { %v1249_v13 = vperm.slane %v1079_v24, %v3745_v39  ;;  %v1243_v60 = vrot.slane %v1079_v24, 4 }
 0x15b   : > { %v1254_v44 = vrot.slane %v1249_v13, 4  ;;  %v3751_v12 = vperm.slane %v1249_v13, %v3747_v16  ;;  %v1245_v34 = vsel %vm1244_vm8, 0.0, %v1243_v60 }
 0x15c   : > { %v1253_v25 = vperm.slane %v1245_v34, %v3745_v39 }
 0x15d   : > { %v1274_v51 = vrot.slane %v3751_v12, 4  ;;  %v1255_v58 = vsel %vm1244_vm8, 0.0, %v1254_v44 }
 0x15e   : > { %v1263_v53 = vperm.slane %v1255_v58, %v3747_v16  ;;  %v1269_v23 = vperm.slane %v1253_v25, %v3747_v16  ;;  %v1264_v22 = vrot.slane %v1253_v25, 4 }
 0x15f   : > { %v1275_v43 = vsel %vm1244_vm8, 0.0, %v1274_v51  ;;  %v3782_v36 = vpop.f32.mrf.mxu2 }
 0x160   : > { %1556 = vrot.lane.b32.xlu0 %v1275_v43, %s3107_s12  ;;  %1588 = vrot.lane.b32.xlu2 %v1263_v53, %s3108_s13  ;;  %v1102_v41 = vpop.f32.mrf.mxu1  ;;  %v1276_v17 = vrot.slane %v1263_v53, 4  ;;  %v1325_v61 = vperm.slane %v3782_v36, %v3745_v39  ;;  %v1278_v20 = vrot.slane %v1269_v23, 4  ;;  %v1265_v24 = vsel %vm1244_vm8, 0.0, %v1264_v22 }
 0x161   : > { %v1282_v54 = vrot.slane %v1102_v41, 4  ;;  %v1287_v52 = vperm.slane %v1102_v41, %v3745_v39  ;;  %v1320_v53 = vrot.slane %v3782_v36, 4  ;;  %v3841_v60 = vperm.slane %v1265_v24, %v3747_v16 }
 0x162   : > { %v1277_v18 = vsel %vm1244_vm8, 0.0, %v1276_v17  ;;  %v3808_v33 = vperm.slane %v1325_v61, %v3747_v16  ;;  %v1279_v40 = vsel %vm1244_vm8, 0.0, %v1278_v20 }
 0x163   : > { %v1283_v26 = vsel %vm1244_vm8, 0.0, %v1282_v54  ;;  %v1292_v63 = vrot.slane %v1287_v52, 4  ;;  %v3762_v42 = vperm.slane %v1287_v52, %v3747_v16  ;;  %v1330_v54 = vrot.slane %v1325_v61, 4 }
 0x164   : > { %v1291_v31 = vperm.slane %v1283_v26, %v3745_v39  ;;  %v1350_v0 = vrot.slane %v3808_v33, 4 }
 0x165   : > { %v1312_v6 = vrot.slane %v3762_v42, 4  ;;  %v1293_v7 = vsel %vm1244_vm8, 0.0, %v1292_v63 }
 0x166   : > { %v1301_v11 = vperm.slane %v1293_v7, %v3747_v16  ;;  %v1307_v57 = vperm.slane %v1291_v31, %v3747_v16  ;;  %v1302_v62 = vrot.slane %v1291_v31, 4  ;;  %v1351_v26 = vsel %vm1244_vm8, 0.0, %v1350_v0 }
 0x167   : > { %v1313_v8 = vsel %vm1244_vm8, 0.0, %v1312_v6  ;;  %v1148_v55 = vpop.f32.mrf.mxu3 }
 0x168   : > { %1558 = vrot.lane.b32.xlu0 %v1313_v8, %s3107_s12  ;;  %1590 = vrot.lane.b32.xlu2 %v1301_v11, %s3108_s13  ;;  %v1358_v5 = vrot.slane %v1148_v55, 4  ;;  %v1194_v50 = vpop.f32.mrf.mxu1  ;;  %v1316_v27 = vrot.slane %v1307_v57, 4  ;;  %v1363_v49 = vperm.slane %v1148_v55, %v3745_v39  ;;  %v1303_v47 = vsel %vm1244_vm8, 0.0, %v1302_v62 }
 0x169   : > { %1654 = vrot.lane.b32.xlu1 %v1307_v57, %s3109_s14  ;;  %v1434_v1 = vrot.slane %v1194_v50, 4  ;;  %v1314_v38 = vrot.slane %v1301_v11, 4  ;;  %v3814_v37 = vperm.slane %v1303_v47, %v3747_v16  ;;  %v3835_v44 = vperm.slane %v1194_v50, %v3745_v39 }
 0x16a   : > { %v1359_v9 = vsel %vm1244_vm8, 0.0, %v1358_v5  ;;  %v1317_v46 = vsel %vm1244_vm8, 0.0, %v1316_v27  ;;  %v3820_v29 = vperm.slane %v1363_v49, %v3747_v16  ;;  %v1368_v52 = vrot.slane %v1363_v49, 4 }
 0x16b   : > { %v3777_v28 = vperm.slane %v1359_v9, %v3745_v39  ;;  %v1435_v15 = vsel %vm1244_vm8, 0.0, %v1434_v1  ;;  %v1315_v56 = vsel %vm1244_vm8, 0.0, %v1314_v38  ;;  %v1444_v57 = vrot.slane %v3835_v44, 4 }
 0x16c   : > { %v1443_v48 = vperm.slane %v1435_v15, %v3745_v39  ;;  %v1388_v51 = vrot.slane %v3820_v29, 4  ;;  %v1369_v9 = vsel %vm1244_vm8, 0.0, %v1368_v52 }
 0x16d   : > { %v1378_v32 = vrot.slane %v3777_v28, 4  ;;  %v1445_v62 = vsel %vm1244_vm8, 0.0, %v1444_v57 }
 0x16e   : > { %v1454_v10 = vrot.slane %v1443_v48, 4  ;;  %v3791_v19 = vperm.slane %v1443_v48, %v3747_v16  ;;  %v1389_v34 = vsel %vm1244_vm8, 0.0, %v1388_v51  ;;  %v1321_v48 = vsel %vm1244_vm8, 0.0, %v1320_v53 }
 0x16f   : > { %v1379_v45 = vsel %vm1244_vm8, 0.0, %v1378_v32  ;;  %v1331_v32 = vsel %vm1244_vm8, 0.0, %v1330_v54 }
 0x170   : > { %1652 = vrot.lane.b32.xlu0 %v1269_v23, %s3109_s14  ;;  %1686 = vrot.lane.b32.xlu2 %v1317_v46, %s3110_s28  ;;  %v3797_v2 = vperm.slane %v1379_v45, %v3747_v16  ;;  %v1468_v4 = vrot.slane %v3791_v19, 4  ;;  %v1455_v21 = vsel %vm1244_vm8, 0.0, %v1454_v10  ;;  %v3880_v45 = vperm.slane %v1369_v9, %v3747_v16 }
 0x171   : > { %1620 = vrot.lane.b32.xlu1 %v1277_v18, %s3111_s16  ;;  %v3817_v30 = vperm.slane %v1455_v21, %v3747_v16  ;;  %v3892_v21 = vperm.slane %v1445_v62, %v3747_v16  ;;  %v1280_v9 = vrot.slane %v3841_v60, 4 }
 0x172   : > { %v1394_v35 = vrot.slane %v3797_v2, 4  ;;  %v3804_v14 = vsel %vm1244_vm8, 0.0, %v1468_v4 }
 0x173   : > { %v1470_v3 = vrot.slane %v3817_v30, 4 }
 0x174   : > { %v3811_v59 = vsel %vm1244_vm8, 0.0, %v1394_v35 }
 0x175   : > { %v3832_v13 = vsel %vm1244_vm8, 0.0, %v1470_v3  ;;  %v1339_v3 = vperm.slane %v1331_v32, %v3747_v16 }
 0x177   : > { %v1352_v54 = vrot.slane %v1339_v3, 4 }
 0x178   : > { %1684 = vrot.lane.b32.xlu0 %v1279_v40, %s3110_s28  ;;  %1718 = vrot.lane.b32.xlu2 %v3814_v37, %s3112_s17  ;;  %v1217_v58 = vpop.f32.mrf.mxu2 }
 0x179   : > { %1622 = vrot.lane.b32.xlu1 %v1315_v56, %s3111_s16  ;;  %v1472_v43 = vrot.slane %v1217_v58, 4  ;;  %v1477_v41 = vperm.slane %v1217_v58, %v3745_v39 }
 0x17a   : > { %v1171_v63 = vpop.f32.mrf.mxu0 }
 0x17b   : > { %v1396_v31 = vrot.slane %v1171_v63, 4  ;;  %v1401_v6 = vperm.slane %v1171_v63, %v3745_v39  ;;  %v1473_v7 = vsel %vm1244_vm8, 0.0, %v1472_v43  ;;  %v1482_v11 = vrot.slane %v1477_v41, 4 }
 0x17c   : > { %v1481_v8 = vperm.slane %v1473_v7, %v3745_v39  ;;  %v3850_v55 = vperm.slane %v1477_v41, %v3747_v16  ;;  %v1329_v43 = vperm.slane %v1321_v48, %v3745_v39 }
 0x17d   : > { %v1397_v5 = vsel %vm1244_vm8, 0.0, %v1396_v31  ;;  %v1406_v50 = vrot.slane %v1401_v6, 4  ;;  %v3856_v1 = vperm.slane %v1401_v6, %v3747_v16  ;;  %v1483_v25 = vsel %vm1244_vm8, 0.0, %v1482_v11 }
 0x17e   : > { %v1405_v27 = vperm.slane %v1397_v5, %v3745_v39  ;;  %v1492_v15 = vrot.slane %v1481_v8, 4  ;;  %v3864_v17 = vperm.slane %v1481_v8, %v3747_v16  ;;  %v3870_v23 = vperm.slane %v1483_v25, %v3747_v16 }
 0x17f   : > { %v1407_v36 = vsel %vm1244_vm8, 0.0, %v1406_v50  ;;  %v1340_v52 = vrot.slane %v1329_v43, 4  ;;  %v1345_v31 = vperm.slane %v1329_v43, %v3747_v16  ;;  %v1353_v6 = vsel %vm1244_vm8, 0.0, %v1352_v54 }
 0x180   : > { %1562 = vrot.lane.b32.xlu0 %v1389_v34, %s3107_s12  ;;  %1560 = vrot.lane.b32.xlu2 %v1351_v26, %s3107_s12  ;;  %v1416_v46 = vrot.slane %v1405_v27, 4  ;;  %v3874_v18 = vperm.slane %v1407_v36, %v3747_v16  ;;  %v3877_v10 = vperm.slane %v1405_v27, %v3747_v16  ;;  %v1506_v61 = vrot.slane %v3864_v17, 4 }
 0x181   : > { %1716 = vrot.lane.b32.xlu1 %v3841_v60, %s3112_s17  ;;  %v1493_v4 = vsel %vm1244_vm8, 0.0, %v1492_v15  ;;  %v1504_v49 = vrot.slane %v3870_v23, 4  ;;  %v1383_v26 = vperm.slane %v3777_v28, %v3747_v16  ;;  %v1318_v5 = vrot.slane %v3814_v37, 4 }
 0x182   : > { %v1430_v20 = vrot.slane %v3877_v10, 4  ;;  %v1428_v47 = vrot.slane %v3874_v18, 4  ;;  %v1417_v35 = vsel %vm1244_vm8, 0.0, %v1416_v46  ;;  %v3889_v38 = vperm.slane %v1493_v4, %v3747_v16 }
 0x183   : > { %v3895_v22 = vsel %vm1244_vm8, 0.0, %v1506_v61  ;;  %v3898_v40 = vperm.slane %v1417_v35, %v3747_v16  ;;  %v3901_v56 = vsel %vm1244_vm8, 0.0, %v1504_v49  ;;  %v1341_v50 = vsel %vm1244_vm8, 0.0, %v1340_v52 }
 0x184   : > { %v3905_v0 = vsel %vm1244_vm8, 0.0, %v1430_v20  ;;  %v3908_v24 = vsel %vm1244_vm8, 0.0, %v1428_v47  ;;  %v1508_v51 = vrot.slane %v3889_v38, 4  ;;  %v3946_v32 = vperm.slane %v1341_v50, %v3747_v16 }
 0x185   : > { %v1432_v58 = vrot.slane %v3898_v40, 4  ;;  %v1319_v62 = vsel %vm1244_vm8, 0.0, %v1318_v5  ;;  %v1281_v60 = vsel %vm1244_vm8, 0.0, %v1280_v9  ;;  %v1426_v20 = vrot.slane %v3856_v1, 4  ;;  %v4078_v5 = vld [vmem:[%s4660_s4 + $0x50] sm:$0xff] }
 0x186   : > { %v3918_v53 = vsel %vm1244_vm8, 0.0, %v1508_v51  ;;  %v3972_v35 = vperm.slane %v3835_v44, %v3747_v16  ;;  %v1354_v44 = vrot.slane %v1345_v31, 4  ;;  %v1392_v54 = vrot.slane %v1383_v26, 4 }
 0x187   : > { %v3922_v41 = vsel %vm1244_vm8, 0.0, %v1432_v58 }
 0x188   : > { %1594 = vrot.lane.b32.xlu2 %v3880_v45, %s3108_s13  ;;  %1598 = vrot.lane.b32.xlu0 %v3892_v21, %s3108_s13  ;;  %v1464_v51 = vrot.slane %v3972_v35, 4  ;;  %v1355_v43 = vsel %vm1244_vm8, 0.0, %v1354_v44  ;;  %v1393_v52 = vsel %vm1244_vm8, 0.0, %v1392_v54 }
 0x189   : > { %1592 = vrot.lane.b32.xlu1 %v1339_v3, %s3108_s13  ;;  %v1427_v3 = vsel %vm1244_vm8, 0.0, %v1426_v20  ;;  %v4182_v20 = vld [vmem:[%s4660_s4 + $0x10] sm:$0xff] }
 0x18a   : > { %v1465_v58 = vsel %vm1244_vm8, 0.0, %v1464_v51  ;;  %v4206_v51 = vld [vmem:[%s4660_s4] sm:$0xff] }
 0x18b   : > { %v1240_v63 = vpop.f32.mrf.mxu3 }
 0x18c   : > { %v1510_v7 = vrot.slane %v1240_v63, 4  ;;  %v1515_v11 = vperm.slane %v1240_v63, %v3745_v39  ;;  %v4004_v63 = vpop.permute.xlu1 %1912 }
 0x18e   : > { %v1511_v57 = vsel %vm1244_vm8, 0.0, %v1510_v7  ;;  %v1520_v34 = vrot.slane %v1515_v11, 4  ;;  %v3934_v8 = vperm.slane %v1515_v11, %v3747_v16  ;;  %v4021_v7 = vld [vmem:[%s4660_s4 + $0x78] sm:$0xff]  ;;  %v4045_v11 = vld [vmem:[%s4660_s4 + $0x68] sm:$0xff] }
 0x18f   : > { %v1519_v28 = vperm.slane %v1511_v57, %v3745_v39  ;;  %2039 = vmatpush.msra.mxu1 %v4021_v7  ;;  %2013 = vmatpush.msra.mxu0 %v4021_v7 }
 0x190   : > { %1658 = vrot.lane.b32.xlu2 %v1383_v26, %s3109_s14  ;;  %1624 = vrot.lane.b32.xlu0 %v1353_v6, %s3111_s16  ;;  %v1521_v25 = vsel %vm1244_vm8, 0.0, %v1520_v34  ;;  %v1466_v26 = vrot.slane %v3892_v21, 4  ;;  %v1502_v6 = vrot.slane %v3850_v55, 4 }
 0x191   : > { %1656 = vrot.lane.b32.xlu1 %v1345_v31, %s3109_s14  ;;  %v1530_v27 = vrot.slane %v1519_v28, 4  ;;  %v1529_v15 = vperm.slane %v1521_v25, %v3747_v16  ;;  %v3943_v48 = vperm.slane %v1519_v28, %v3747_v16  ;;  %v4006_v31 = vpop.permute.xlu0 %1846  ;;  %2065 = vmatpush.msra.mxu2 %v4021_v7  ;;  %v4066_v28 = vld [vmem:[%s4660_s4 + $0x58] sm:$0xff] }
 0x192   : > { %2091 = vmatpush.msra.mxu3 %v4021_v7  ;;  %v1503_v21 = vsel %vm1244_vm8, 0.0, %v1502_v6 }
 0x193   : > { %v1544_v36 = vrot.slane %v3943_v48, 4  ;;  %v1542_v39 = vrot.slane %v1529_v15, 4  ;;  %v1531_v37 = vsel %vm1244_vm8, 0.0, %v1530_v27  ;;  %v1356_v27 = vrot.slane %v3946_v32, 4 }
 0x194   : > { %v3952_v46 = vperm.slane %v1531_v37, %v3747_v16  ;;  %v1540_v16 = vrot.slane %v3934_v8, 4  ;;  %v4123_v37 = vld [vmem:[%s4660_s4 + $0x38] sm:$0xff] }
 0x195   : > { %v3959_v61 = vsel %vm1244_vm8, 0.0, %v1544_v36  ;;  %v3962_v4 = vsel %vm1244_vm8, 0.0, %v1542_v39  ;;  %v4117_v39 = vld [vmem:[%s4660_s4 + $0x40] sm:$0xff] }
 0x196   : > { %v1546_v49 = vrot.slane %v3952_v46, 4 }
 0x198   : > { %1750 = vrot.lane.b32.xlu2 %v1319_v62, %s3113_s18  ;;  %1720 = vrot.lane.b32.xlu0 %v3946_v32, %s3112_s17  ;;  %v3968_v47 = vsel %vm1244_vm8, 0.0, %v1546_v49 }
 0x199   : > { %1748 = vrot.lane.b32.xlu1 %v1281_v60, %s3113_s18  ;;  %v4048_v57 = vpop.permute.xlu0 %1851 }
 0x1a0   : > { %1564 = vrot.lane.b32.xlu2 %v1427_v3, %s3107_s12  ;;  %1722 = vrot.lane.b32.xlu0 %v3797_v2, %s3112_s17  ;;  %v1541_v2 = vsel %vm1244_vm8, 0.0, %v1540_v16 }
 0x1a1   : > { %1596 = vrot.lane.b32.xlu1 %v3874_v18, %s3108_s13  ;;  %v3993_v18 = vpop.permute.xlu2 %1917 }
 0x1a8   : > { %1566 = vrot.lane.b32.xlu2 %v1465_v58, %s3107_s12  ;;  %1694 = vrot.lane.b32.xlu0 %v3804_v14, %s3110_s28  ;;  %v1390_v14 = vrot.slane %v3880_v45, 4 }
 0x1a9   : > { %1660 = vrot.lane.b32.xlu1 %v3877_v10, %s3109_s14 }
 0x1aa   : > { %v1391_v10 = vsel %vm1244_vm8, 0.0, %v1390_v14 }
 0x1b0   : > { %1662 = vrot.lane.b32.xlu2 %v3791_v19, %s3109_s14  ;;  %1570 = vrot.lane.b32.xlu0 %v1541_v2, %s3107_s12 }
 0x1b1   : > { %1688 = vrot.lane.b32.xlu1 %v1355_v43, %s3110_s28 }
 0x1b8   : > { %1626 = vrot.lane.b32.xlu2 %v1391_v10, %s3111_s16  ;;  %1602 = vrot.lane.b32.xlu0 %v1529_v15, %s3108_s13  ;;  %v1357_v15 = vsel %vm1244_vm8, 0.0, %v1356_v27 }
 0x1b9   : > { %1690 = vrot.lane.b32.xlu1 %v1393_v52, %s3110_s28 }
 0x1ba   : > { %v4002_v19 = vpop.permute.xlu2 %1588 }
 0x1c0   : > { %1628 = vrot.lane.b32.xlu2 %v3908_v24, %s3111_s16  ;;  %1664 = vrot.lane.b32.xlu0 %v3864_v17, %s3109_s14  ;;  %v4026_v24 = vld [vmem:[%s4660_s4 + $0x70] sm:$0xff]  ;;  %v1467_v17 = vsel %vm1244_vm8, 0.0, %v1466_v26 }
 0x1c1   : > { %1692 = vrot.lane.b32.xlu1 %v3905_v0, %s3110_s28  ;;  %2040 = vmatpush.msra.mxu1 %v4026_v24  ;;  %v4039_v0 = vpop.permute.xlu1 %1856 }
 0x1c2   : > { %v4014_v45 = vpop.permute.xlu2 %1590  ;;  %2014 = vmatpush.msra.mxu0 %v4026_v24  ;;  %2066 = vmatpush.msra.mxu2 %v4026_v24 }
 0x1c3   : > { %2041 = vmatpush.msra.mxu1 %v4045_v11  ;;  %2092 = vmatpush.msra.mxu3 %v4026_v24 }
 0x1c4   : > { %2015 = vmatpush.msra.mxu0 %v4045_v11  ;;  %2067 = vmatpush.msra.mxu2 %v4045_v11 }
 0x1c5   : > { %2093 = vmatpush.msra.mxu3 %v4045_v11 }
 0x1c8   : > { %1630 = vrot.lane.b32.xlu2 %v1467_v17, %s3111_s16  ;;  %1696 = vrot.lane.b32.xlu0 %v3895_v22, %s3110_s28  ;;  %v4059_v22 = vld [vmem:[%s4660_s4 + $0x60] sm:$0xff] }
 0x1c9   : > { %1568 = vrot.lane.b32.xlu1 %v1503_v21, %s3107_s12  ;;  %2042 = vmatpush.msra.mxu1 %v4059_v22  ;;  %v4094_v9 = vpop.permute.xlu1 %1922 }
 0x1ca   : > { %v4050_v34 = vpop.permute.xlu2 %1686  ;;  %2016 = vmatpush.msra.mxu0 %v4059_v22  ;;  %2068 = vmatpush.msra.mxu2 %v4059_v22 }
 0x1cb   : > { %2094 = vmatpush.msra.mxu3 %v4059_v22  ;;  %2043 = vmatpush.msra.mxu1 %v4066_v28 }
 0x1cc   : > { %2017 = vmatpush.msra.mxu0 %v4066_v28  ;;  %2069 = vmatpush.msra.mxu2 %v4066_v28 }
 0x1cd   : > { %2044 = vmatpush.msra.mxu1 %v4078_v5  ;;  %2095 = vmatpush.msra.mxu3 %v4066_v28 }
 0x1ce   : > { %2018 = vmatpush.msra.mxu0 %v4078_v5  ;;  %2070 = vmatpush.msra.mxu2 %v4078_v5 }
 0x1cf   : > { %2096 = vmatpush.msra.mxu3 %v4078_v5 }
 0x1d0   : > { %1724 = vrot.lane.b32.xlu2 %v3898_v40, %s3112_s17  ;;  %1698 = vrot.lane.b32.xlu0 %v3959_v61, %s3110_s28  ;;  %v4090_v40 = vld [vmem:[%s4660_s4 + $0x48] sm:$0xff]  ;;  %s2737_s28 = scalar_lea.hbm %s4667_s11, %s4690_s25 }
 0x1d1   : > { %1666 = vrot.lane.b32.xlu1 %v3943_v48, %s3109_s14  ;;  %2045 = vmatpush.msra.mxu1 %v4090_v40 }
 0x1d2   : > { %v4083_v50 = vpop.permute.xlu0 %1556  ;;  %v4085_v25 = vpop.permute.xlu2 %1718  ;;  %2019 = vmatpush.msra.mxu0 %v4090_v40  ;;  %2071 = vmatpush.msra.mxu2 %v4090_v40 }
 0x1d3   : > { %2097 = vmatpush.msra.mxu3 %v4090_v40  ;;  %2046 = vmatpush.msra.mxu1 %v4117_v39 }
 0x1d4   : > { %2020 = vmatpush.msra.mxu0 %v4117_v39  ;;  %2072 = vmatpush.msra.mxu2 %v4117_v39 }
 0x1d5   : > { %2098 = vmatpush.msra.mxu3 %v4117_v39  ;;  %2047 = vmatpush.msra.mxu1 %v4123_v37 }
 0x1d6   : > { %2021 = vmatpush.msra.mxu0 %v4123_v37  ;;  %2073 = vmatpush.msra.mxu2 %v4123_v37 }
 0x1d7   : > { %2099 = vmatpush.msra.mxu3 %v4123_v37 }
 0x1d8   : > { %1752 = vrot.lane.b32.xlu2 %v1357_v15, %s3113_s18  ;;  %1760 = vrot.lane.b32.xlu0 %v3918_v53, %s3113_s18  ;;  %v4135_v53 = vld [vmem:[%s4660_s4 + $0x30] sm:$0xff] }
 0x1d9   : > { %1634 = vrot.lane.b32.xlu1 %v3962_v4, %s3111_s16  ;;  %2048 = vmatpush.msra.mxu1 %v4135_v53  ;;  %v4167_v4 = vld [vmem:[%s4660_s4 + $0x18] sm:$0xff] }
 0x1da   : > { %v1559_v48 = vpop.permute.xlu0 %1558  ;;  %v4112_v32 = vpop.permute.xlu2 %1560  ;;  %2022 = vmatpush.msra.mxu0 %v4135_v53  ;;  %2074 = vmatpush.msra.mxu2 %v4135_v53 }
 0x1db   : > { %v1655_v36 = vpop.permute.xlu1 %1654  ;;  %2100 = vmatpush.msra.mxu3 %v4135_v53  ;;  %v1773_v49 = vsel %vm834_vm1, %v3762_v42, %v1559_v48  ;;  %v4194_v42 = vld [vmem:[%s4660_s4 + $0x8] sm:$0xff] }
 0x1e0   : > { %1754 = vrot.lane.b32.xlu2 %v3811_v59, %s3113_s18  ;;  %1762 = vrot.lane.b32.xlu0 %v3968_v47, %s3113_s18  ;;  %v4147_v59 = vld [vmem:[%s4660_s4 + $0x28] sm:$0xff] }
 0x1e1   : > { %1730 = vrot.lane.b32.xlu1 %v3952_v46, %s3112_s17  ;;  %v4158_v46 = vld [vmem:[%s4660_s4 + $0x20] sm:$0xff]  ;;  %2049 = vmatpush.msra.mxu1 %v4147_v59 }
 0x1e2   : > { %v4140_v62 = vpop.permute.xlu0 %1652  ;;  %v4142_v60 = vpop.permute.xlu2 %1594  ;;  %2023 = vmatpush.msra.mxu0 %v4147_v59  ;;  %2075 = vmatpush.msra.mxu2 %v4147_v59 }
 0x1e3   : > { %v4151_v61 = vpop.permute.xlu1 %1620  ;;  %2050 = vmatpush.msra.mxu1 %v4158_v46  ;;  %2101 = vmatpush.msra.mxu3 %v4147_v59 }
 0x1e4   : > { %2024 = vmatpush.msra.mxu0 %v4158_v46  ;;  %2076 = vmatpush.msra.mxu2 %v4158_v46 }
 0x1e5   : > { %2051 = vmatpush.msra.mxu1 %v4167_v4  ;;  %2102 = vmatpush.msra.mxu3 %v4158_v46 }
 0x1e6   : > { %2025 = vmatpush.msra.mxu0 %v4167_v4  ;;  %2077 = vmatpush.msra.mxu2 %v4167_v4 }
 0x1e7   : > { %2052 = vmatpush.msra.mxu1 %v4182_v20  ;;  %2103 = vmatpush.msra.mxu3 %v4167_v4 }
 0x1e8   : > { %1600 = vrot.lane.b32.xlu2 %v3870_v23, %s3108_s13  ;;  %1756 = vrot.lane.b32.xlu0 %v3922_v41, %s3113_s18  ;;  %v1781_v23 = vsel %vm681_vm0, %v1773_v49, %v4014_v45  ;;  %s630_s13 = scalar_lea.vmem [#allocation5], %s3315_s15 }
 0x1e9   : > { %1726 = vrot.lane.b32.xlu1 %v3817_v30, %s3112_s17  ;;  %2053 = vmatpush.msra.mxu1 %v4194_v42  ;;  %s2739_s10 = sshll.u32 %s630_s13, 4  ;;  %s2740_s10 = int_to_ptr.vmem [resolvable:$true] %s2739_s10 }
 0x1ea   : > { %v4187_v47 = vpop.permute.xlu0 %1684  ;;  %v4189_v3 = vpop.permute.xlu2 %1658  ;;  %2026 = vmatpush.msra.mxu0 %v4182_v20  ;;  %2078 = vmatpush.msra.mxu2 %v4182_v20 }
 0x1eb   : > { %v1623_v30 = vpop.permute.xlu1 %1622  ;;  %2054 = vmatpush.msra.mxu1 %v4206_v51  ;;  %2104 = vmatpush.msra.mxu3 %v4182_v20 }
 0x1ec   : > { %v1790_v41 = vsel %vm1788_vm9, %v1781_v23, %v1623_v30  ;;  %2027 = vmatpush.msra.mxu0 %v4194_v42  ;;  %2079 = vmatpush.msra.mxu2 %v4194_v42 }
 0x1ed   : > { %v1799_v58 = vsel %vm1797_vm10, %v1790_v41, %v1655_v36  ;;  %2105 = vmatpush.msra.mxu3 %v4194_v42  ;;  %2143 = vmatpush.msrb.mxu1 %v4021_v7 }
 0x1ee   : > { %v1808_v16 = vsel %vm1806_vm11, %v1799_v58, %v4050_v34  ;;  %2028 = vmatpush.msra.mxu0 %v4206_v51  ;;  %2080 = vmatpush.msra.mxu2 %v4206_v51 }
 0x1ef   : > { %v1817_v43 = vsel %vm1815_vm12, %v1808_v16, %v4085_v25  ;;  %2106 = vmatpush.msra.mxu3 %v4206_v51  ;;  %2144 = vmatpush.msrb.mxu1 %v4026_v24 }
 0x1f0   : > { %1632 = vrot.lane.b32.xlu2 %v3901_v56, %s3111_s16  ;;  %2169 = vmatpush.msrb.mxu2 %v4021_v7  ;;  %s2741_s16 = sshll.u32 %s2737_s28, 4  ;;  %s2742_s16 = int_to_ptr.hbm [resolvable:$true] %s2741_s16 }
 0x1f1   : > { %2195 = vmatpush.msrb.mxu3 %v4021_v7  ;;  %2117 = vmatpush.msrb.mxu0 %v4021_v7 }
 0x1f2   : > { %v1563_v44 = vpop.permute.xlu0 %1562  ;;  %v1751_v2 = vpop.permute.xlu2 %1750  ;;  %2170 = vmatpush.msrb.mxu2 %v4026_v24  ;;  %2145 = vmatpush.msrb.mxu1 %v4045_v11 }
 0x1f3   : > { %v1775_v14 = vsel %vm834_vm1, %v3820_v29, %v1563_v44  ;;  %v1826_v56 = vsel %vm1824_vm13, %v1817_v43, %v1751_v2  ;;  %v4231_v54 = vpop.permute.xlu1 %1716  ;;  %2196 = vmatpush.msrb.mxu3 %v4026_v24  ;;  %2118 = vmatpush.msrb.mxu0 %v4026_v24 }
 0x1f4   : > { %v1837_v10 = vperm.slane %v1826_v56, 0  ;;  %v4237_v52 = vsel %vm681_vm0, %v1775_v14, %v4142_v60  ;;  %2171 = vmatpush.msrb.mxu2 %v4045_v11  ;;  %2146 = vmatpush.msrb.mxu1 %v4059_v22 }
 0x1f5   : > { %2197 = vmatpush.msrb.mxu3 %v4045_v11  ;;  %2119 = vmatpush.msrb.mxu0 %v4045_v11 }
 0x1f6   : > { %v1862_v29 = vsub.f32 %v1837_v10, %v4006_v31  ;;  %v1863_v45 = vsub.f32 %v1837_v10, %v4048_v57  ;;  %2172 = vmatpush.msrb.mxu2 %v4059_v22  ;;  %2147 = vmatpush.msrb.mxu1 %v4066_v28  ;;  %v1864_v11 = vsub.f32 %v1837_v10, %v4039_v0 }
 0x1f7   : > { %2198 = vmatpush.msrb.mxu3 %v4059_v22  ;;  %2120 = vmatpush.msrb.mxu0 %v4059_v22  ;;  %v1772_v22 = vsel %vm834_vm1, %v3751_v12, %v4083_v50 }
 0x1f8   : > { %v1886_v26 = vmul.f32 %v1862_v29, %v1862_v29  ;;  %1728 = vrot.lane.b32.xlu2 %v3889_v38, %s3112_s17  ;;  %v1887_v6 = vmul.f32 %v1863_v45, %v1863_v45  ;;  %2173 = vmatpush.msrb.mxu2 %v4066_v28  ;;  %v1780_v50 = vsel %vm681_vm0, %v1772_v22, %v4002_v19  ;;  %s2729_s17 = scalar_lea.sflag [#allocation6], %s3315_s15 }
 0x1f9   : > { %2199 = vmatpush.msrb.mxu3 %v4066_v28  ;;  %2121 = vmatpush.msrb.mxu0 %v4066_v28  ;;  %v1888_v28 = vmul.f32 %v1864_v11, %v1864_v11  ;;  %v1774_v22 = vsel %vm834_vm1, %v3808_v33, %v4112_v32 }
 0x1fa   : > { %v1928_v7 = vmul.f32 %v4004_v63, %v1886_v26  ;;  %v4255_v17 = vpop.permute.xlu2 %1564  ;;  %v1599_v21 = vpop.permute.xlu0 %1598  ;;  %v1929_v34 = vmul.f32 %v3993_v18, %v1887_v6  ;;  %2174 = vmatpush.msrb.mxu2 %v4078_v5  ;;  %2148 = vmatpush.msrb.mxu1 %v4078_v5 }
 0x1fb   : > { %v4259_v24 = vpop.permute.xlu1 %1592  ;;  %2200 = vmatpush.msrb.mxu3 %v4078_v5  ;;  %2122 = vmatpush.msrb.mxu0 %v4078_v5  ;;  %v1776_v58 = vsel %vm834_vm1, %v3856_v1, %v4255_v17 }
 0x1fc   : > { %v1955_v38 = vmul.f32 1.442695, %v1928_v7  ;;  %2175 = vmatpush.msrb.mxu2 %v4090_v40  ;;  %v1957_v15 = vmul.f32 1.442695, %v1929_v34  ;;  %2149 = vmatpush.msrb.mxu1 %v4090_v40 }
 0x1fd   : > { %2201 = vmatpush.msrb.mxu3 %v4090_v40  ;;  %2123 = vmatpush.msrb.mxu0 %v4090_v40  ;;  %v1930_v40 = vmul.f32 %v4094_v9, %v1888_v28  ;;  %v1782_v28 = vsel %vm681_vm0, %v1774_v22, %v4259_v24 }
 0x1fe   : > { %2940 = vpow2.f32 %v1955_v38  ;;  %2176 = vmatpush.msrb.mxu2 %v4117_v39  ;;  %2150 = vmatpush.msrb.mxu1 %v4117_v39 }
 0x1ff   : > { %2202 = vmatpush.msrb.mxu3 %v4117_v39  ;;  %2124 = vmatpush.msrb.mxu0 %v4117_v39  ;;  %2942 = vpow2.f32 %v1957_v15 }
 0x200   : > { %1758 = vrot.lane.b32.xlu2 %v3832_v13, %s3113_s18  ;;  %2177 = vmatpush.msrb.mxu2 %v4123_v37  ;;  %s3054_s18 = sshra.s32 %s2742_s16, 4  ;;  %s3055_s18 = int_to_ptr.hbm [resolvable:$true] %s3054_s18 }
 0x201   : > { %2203 = vmatpush.msrb.mxu3 %v4123_v37  ;;  %2125 = vmatpush.msrb.mxu0 %v4123_v37  ;;  %s3056_s23 = scalar_lea.hbm %s3055_s18, 1  ;;  %p3061_p2 = scmp.lt.s32.totalorder %s3055_s18, %s4667_s11 }
 0x202   : > { %v1567_v25 = vpop.permute.xlu2 %1566  ;;  %v4281_v27 = vpop.permute.xlu0 %1624  ;;  %2178 = vmatpush.msrb.mxu2 %v4135_v53  ;;  %2151 = vmatpush.msrb.mxu1 %v4123_v37  ;;  %p3057_p13 = scmp.ne.s32.totalorder %s3055_s18, %s3056_s23  ;;  %p3062_p3 = scmp.lt.s32.totalorder %s3060_s26, %s3056_s23 }
 0x203   : > { %v1777_v13 = vsel %vm834_vm1, %v3972_v35, %v1567_v25  ;;  %v4287_v5 = vpop.permute.xlu1 %1656  ;;  %v1789_v35 = vsel %vm1788_vm9, %v1780_v50, %v4151_v61  ;;  %2204 = vmatpush.msrb.mxu3 %v4135_v53  ;;  %2126 = vmatpush.msrb.mxu0 %v4135_v53  ;;  %v1959_v61 = vmul.f32 1.442695, %v1930_v40 }
 0x204   : > { %v2941_v48 = vpop.eup %2940  ;;  %v4292_v12 = vsel %vm681_vm0, %v1777_v13, %v1599_v21  ;;  %2179 = vmatpush.msrb.mxu2 %v4147_v59  ;;  %v1798_v19 = vsel %vm1797_vm10, %v1789_v35, %v4140_v62  ;;  %2152 = vmatpush.msrb.mxu1 %v4135_v53  ;;  %v1791_v13 = vsel %vm1788_vm9, %v1782_v28, %v4281_v27  ;;  %p3058_p0 = pnand %p3057_p13, %p3219_p6  ;;  %p3063_p4 = por %p3062_p3, %p3061_p2 }
 0x205   : > { %2055 = vmatmul.f32.vlgmr.msra.gmra.mxu1 %v2941_v48  ;;  %2205 = vmatpush.msrb.mxu3 %v4147_v59  ;;  %v1807_v36 = vsel %vm1806_vm11, %v1798_v19, %v4187_v47  ;;  %v2943_v53 = vpop.eup %2942  ;;  %2944 = vpow2.f32 %v1959_v61  ;;  %v1800_v50 = vsel %vm1797_vm10, %v1791_v13, %v4287_v5 }
 0x206   : > { %2180 = vmatpush.msrb.mxu2 %v4158_v46  ;;  %2127 = vmatpush.msrb.mxu0 %v4147_v59  ;;  %v1816_v37 = vsel %vm1815_vm12, %v1807_v36, %v4231_v54  ;;  %p3059_p1 = pneg %p3058_p0 }
 0x207   : > { %2206 = vmatpush.msrb.mxu3 %v4158_v46  ;;  %2153 = vmatpush.msrb.mxu1 %v4147_v59 }
 0x208   : > { %2181 = vmatpush.msrb.mxu2 %v4167_v4  ;;  %2128 = vmatpush.msrb.mxu0 %v4158_v46  ;;  %p3064_p5 = pnand %p3063_p4, %p3059_p1 }
 0x209   : > { %2207 = vmatpush.msrb.mxu3 %v4167_v4  ;;  %2154 = vmatpush.msrb.mxu1 %v4158_v46 }
 0x20a   : > { %v4314_v39 = vpop.permute.xlu0 %1720  ;;  %v4316_v60 = vpop.permute.xlu2 %1662  ;;  %2182 = vmatpush.msrb.mxu2 %v4182_v20  ;;  %2129 = vmatpush.msrb.mxu0 %v4167_v4 }
 0x20b   : > { %v1749_v62 = vpop.permute.xlu1 %1748  ;;  %2208 = vmatpush.msrb.mxu3 %v4182_v20  ;;  %2155 = vmatpush.msrb.mxu1 %v4167_v4  ;;  %v2945_v43 = vpop.eup %2944 }
 0x20c   : > { %v1825_v49 = vsel %vm1824_vm13, %v1816_v37, %v1749_v62  ;;  %2183 = vmatpush.msrb.mxu2 %v4194_v42  ;;  %2130 = vmatpush.msrb.mxu0 %v4182_v20 }
 0x20d   : > { %v1836_v47 = vperm.slane %v1825_v49, 0  ;;  %2058 = vmatmul.f32.gmra.mxu1 %v2943_v53  ;;  %2209 = vmatpush.msrb.mxu3 %v4194_v42 }
 0x20e   : > { %2184 = vmatpush.msrb.mxu2 %v4206_v51  ;;  %2156 = vmatpush.msrb.mxu1 %v4182_v20 }
 0x20f   : > { %v1859_v23 = vsub.f32 %v1836_v47, %v4006_v31  ;;  %v1860_v59 = vsub.f32 %v1836_v47, %v4048_v57  ;;  %2210 = vmatpush.msrb.mxu3 %v4206_v51  ;;  %2131 = vmatpush.msrb.mxu0 %v4194_v42  ;;  %v1861_v56 = vsub.f32 %v1836_v47, %v4039_v0 }
 0x210   : > { %2157 = vmatpush.msrb.mxu1 %v4194_v42 }
 0x211   : > { %v1883_v30 = vmul.f32 %v1859_v23, %v1859_v23  ;;  %v1884_v16 = vmul.f32 %v1860_v59, %v1860_v59  ;;  %2132 = vmatpush.msrb.mxu0 %v4206_v51  ;;  %v1885_v29 = vmul.f32 %v1861_v56, %v1861_v56 }
 0x212   : > { %v4338_v41 = vpop.permute.xlu0 %1722  ;;  %v1627_v46 = vpop.permute.xlu2 %1626  ;;  %2158 = vmatpush.msrb.mxu1 %v4206_v51 }
 0x213   : > { %v1925_v44 = vmul.f32 %v4004_v63, %v1883_v30  ;;  %v1792_v4 = vsel %vm1788_vm9, %v4237_v52, %v1627_v46  ;;  %v1597_v2 = vpop.permute.xlu1 %1596  ;;  %v1926_v54 = vmul.f32 %v3993_v18, %v1884_v16  ;;  %v1927_v42 = vmul.f32 %v4094_v9, %v1885_v29 }
 0x214   : > { %v4350_v14 = vsel %vm681_vm0, %v1776_v58, %v1597_v2  ;;  %v1801_v20 = vsel %vm1797_vm10, %v1792_v4, %v4189_v3 }
 0x215   : > { %v1949_v1 = vmul.f32 1.442695, %v1925_v44  ;;  %2061 = vmatmul.f32.gmra.mxu1 %v2945_v43  ;;  %v1951_v45 = vmul.f32 1.442695, %v1926_v54  ;;  %v1953_v21 = vmul.f32 1.442695, %v1927_v42 }
 0x217   : > { %2946 = vpow2.f32 %v1949_v1 }
 0x218   : > { %2948 = vpow2.f32 %v1951_v45 }
 0x219   : > { %2950 = vpow2.f32 %v1953_v21 }
 0x21a   : > { %v4360_v10 = vpop.permute.xlu2 %1628  ;;  %v1695_v52 = vpop.permute.xlu0 %1694 }
 0x21b   : > { %v4362_v3 = vpop.permute.xlu1 %1660 }
 0x21d   : > { %v2947_v26 = vpop.eup %2946 }
 0x21e   : > { %2029 = vmatmul.f32.vlgmr.msra.gmra.mxu0 %v2947_v26  ;;  %v2949_v11 = vpop.eup %2948 }
 0x222   : > { %v1631_v6 = vpop.permute.xlu2 %1630  ;;  %v4365_v7 = vpop.permute.xlu0 %1570 }
 0x223   : > { %v1794_v51 = vsel %vm1788_vm9, %v4292_v12, %v1631_v6  ;;  %v1689_v17 = vpop.permute.xlu1 %1688  ;;  %v2951_v12 = vpop.eup %2950  ;;  %v1779_v28 = vsel %vm834_vm1, %v3934_v8, %v4365_v7 }
 0x224   : > { %v1803_v38 = vsel %vm1797_vm10, %v1794_v51, %v4316_v60  ;;  %v1809_v35 = vsel %vm1806_vm11, %v1800_v50, %v1689_v17 }
 0x225   : > { %v4372_v34 = vsel %vm1806_vm11, %v1803_v38, %v1695_v52  ;;  %v1818_v33 = vsel %vm1815_vm12, %v1809_v35, %v4314_v39 }
 0x226   : > { %2032 = vmatmul.f32.gmra.mxu0 %v2949_v11 }
 0x22a   : > { %v4379_v25 = vpop.permute.xlu2 %1724  ;;  %v1603_v15 = vpop.permute.xlu0 %1602 }
 0x22b   : > { %v1691_v48 = vpop.permute.xlu1 %1690  ;;  %v1787_v50 = vsel %vm681_vm0, %v1779_v28, %v1603_v15 }
 0x22c   : > { %v1810_v61 = vsel %vm1806_vm11, %v1801_v20, %v1691_v48 }
 0x22d   : > { %v1819_v39 = vsel %vm1815_vm12, %v1810_v61, %v4338_v41 }
 0x22e   : > { %2035 = vmatmul.f32.gmra.mxu0 %v2951_v12 }
 0x232   : > { %v1753_v40 = vpop.permute.xlu2 %1752  ;;  %v1665_v32 = vpop.permute.xlu0 %1664 }
 0x233   : > { %v1827_v24 = vsel %vm1824_vm13, %v1818_v33, %v1753_v40  ;;  %v4389_v19 = vpop.permute.xlu1 %1692 }
 0x234   : > { %v1838_v36 = vperm.slane %v1827_v24, 0 }
 0x236   : > { %v1865_v27 = vsub.f32 %v1838_v36, %v4006_v31  ;;  %v1866_v60 = vsub.f32 %v1838_v36, %v4048_v57  ;;  %v1867_v46 = vsub.f32 %v1838_v36, %v4039_v0 }
 0x238   : > { %v1889_v5 = vmul.f32 %v1865_v27, %v1865_v27  ;;  %v1890_v37 = vmul.f32 %v1866_v60, %v1866_v60  ;;  %v1891_v2 = vmul.f32 %v1867_v46, %v1867_v46  ;;  %v1793_v60 = vsel %vm1788_vm9, %v4350_v14, %v4360_v10 }
 0x23a   : > { %v1931_v62 = vmul.f32 %v4004_v63, %v1889_v5  ;;  %v1755_v53 = vpop.permute.xlu2 %1754  ;;  %v1697_v49 = vpop.permute.xlu0 %1696  ;;  %v1932_v58 = vmul.f32 %v3993_v18, %v1890_v37  ;;  %v1933_v45 = vmul.f32 %v4094_v9, %v1891_v2 }
 0x23b   : > { %v1828_v47 = vsel %vm1824_vm13, %v1819_v39, %v1755_v53  ;;  %v1569_v23 = vpop.permute.xlu1 %1568 }
 0x23c   : > { %v1961_v59 = vmul.f32 1.442695, %v1931_v62  ;;  %v1839_v30 = vperm.slane %v1828_v47, 0  ;;  %v1963_v43 = vmul.f32 1.442695, %v1932_v58  ;;  %v1778_v17 = vsel %vm834_vm1, %v3850_v55, %v1569_v23 }
 0x23d   : > { %v1965_v6 = vmul.f32 1.442695, %v1933_v45  ;;  %v1802_v47 = vsel %vm1797_vm10, %v1793_v60, %v4362_v3 }
 0x23e   : > { %2952 = vpow2.f32 %v1961_v59  ;;  %v1868_v16 = vsub.f32 %v1839_v30, %v4006_v31  ;;  %v1869_v44 = vsub.f32 %v1839_v30, %v4048_v57  ;;  %v1870_v26 = vsub.f32 %v1839_v30, %v4039_v0 }
 0x23f   : > { %2954 = vpow2.f32 %v1963_v43  ;;  %v1811_v14 = vsel %vm1806_vm11, %v1802_v47, %v4389_v19 }
 0x240   : > { %v1892_v4 = vmul.f32 %v1868_v16, %v1868_v16  ;;  %v1893_v20 = vmul.f32 %v1869_v44, %v1869_v44  ;;  %v1894_v51 = vmul.f32 %v1870_v26, %v1870_v26 }
 0x242   : > { %v1934_v41 = vmul.f32 %v4004_v63, %v1892_v4  ;;  %v1601_v1 = vpop.permute.xlu2 %1600  ;;  %v1699_v56 = vpop.permute.xlu0 %1698  ;;  %v1935_v42 = vmul.f32 %v3993_v18, %v1893_v20  ;;  %v1936_v55 = vmul.f32 %v4094_v9, %v1894_v51  ;;  %v1820_v4 = vsel %vm1815_vm12, %v1811_v14, %v4379_v25 }
 0x243   : > { %v1667_v54 = vpop.permute.xlu1 %1666  ;;  %v1786_v13 = vsel %vm681_vm0, %v1778_v17, %v1601_v1  ;;  %vm2437_vm0 = vcmask 64512  }
 0x244   : > { %v2953_v52 = vpop.eup %2952  ;;  %v1967_v29 = vmul.f32 1.442695, %v1934_v41  ;;  %v1969_v11 = vmul.f32 1.442695, %v1935_v42  ;;  %v1971_v27 = vmul.f32 1.442695, %v1936_v55 }
 0x245   : > { %2081 = vmatmul.f32.vlgmr.msra.gmra.mxu2 %v2953_v52  ;;  %v2955_v22 = vpop.eup %2954 }
 0x246   : > { %2956 = vpow2.f32 %v1967_v29 }
 0x247   : > { %2958 = vpow2.f32 %v1965_v6 }
 0x248   : > { %2960 = vpow2.f32 %v1969_v11 }
 0x249   : > { %2962 = vpow2.f32 %v1971_v27 }
 0x24a   : > { %v1633_v21 = vpop.permute.xlu2 %1632  ;;  %v1761_v38 = vpop.permute.xlu0 %1760 }
 0x24b   : > { %v1635_v48 = vpop.permute.xlu1 %1634  ;;  %v1795_v35 = vsel %vm1788_vm9, %v1786_v13, %v1633_v21 }
 0x24c   : > { %v2957_v12 = vpop.eup %2956  ;;  %v1796_v40 = vsel %vm1788_vm9, %v1787_v50, %v1635_v48  ;;  %v1804_v33 = vsel %vm1797_vm10, %v1795_v35, %v1665_v32 }
 0x24d   : > { %2084 = vmatmul.f32.gmra.mxu2 %v2955_v22  ;;  %2107 = vmatmul.f32.vlgmr.msra.gmra.mxu3 %v2957_v12  ;;  %v1805_v8 = vsel %vm1797_vm10, %v1796_v40, %v1667_v54  ;;  %v1813_v24 = vsel %vm1806_vm11, %v1804_v33, %v1697_v49  ;;  %v2959_v15 = vpop.eup %2958 }
 0x24e   : > { %v1814_v5 = vsel %vm1806_vm11, %v1805_v8, %v1699_v56  ;;  %v2961_v62 = vpop.eup %2960 }
 0x24f   : > { %v2963_v41 = vpop.eup %2962 }
 0x252   : > { %v1729_v7 = vpop.permute.xlu2 %1728  ;;  %v1763_v36 = vpop.permute.xlu0 %1762 }
 0x253   : > { %v1822_v61 = vsel %vm1815_vm12, %v1813_v24, %v1729_v7  ;;  %v1731_v37 = vpop.permute.xlu1 %1730 }
 0x254   : > { %v1831_v32 = vsel %vm1824_vm13, %v1822_v61, %v1761_v38  ;;  %v1823_v53 = vsel %vm1815_vm12, %v1814_v5, %v1731_v37 }
 0x255   : > { %v1842_v39 = vperm.slane %v1831_v32, 0  ;;  %v1832_v49 = vsel %vm1824_vm13, %v1823_v53, %v1763_v36  ;;  %2087 = vmatmul.f32.gmra.mxu2 %v2959_v15  ;;  %2110 = vmatmul.f32.gmra.mxu3 %v2961_v62 }
 0x256   : > { %v1843_v23 = vperm.slane %v1832_v49, 0 }
 0x257   : > { %v1877_v10 = vsub.f32 %v1842_v39, %v4006_v31  ;;  %v1878_v59 = vsub.f32 %v1842_v39, %v4048_v57  ;;  %v1879_v6 = vsub.f32 %v1842_v39, %v4039_v0 }
 0x258   : > { %v1880_v30 = vsub.f32 %v1843_v23, %v4006_v31  ;;  %v1881_v46 = vsub.f32 %v1843_v23, %v4048_v57  ;;  %v1882_v21 = vsub.f32 %v1843_v23, %v4039_v0 }
 0x259   : > { %v1901_v58 = vmul.f32 %v1877_v10, %v1877_v10  ;;  %v1902_v2 = vmul.f32 %v1878_v59, %v1878_v59  ;;  %v1903_v48 = vmul.f32 %v1879_v6, %v1879_v6 }
 0x25a   : > { %v1904_v16 = vmul.f32 %v1880_v30, %v1880_v30  ;;  %v1757_v44 = vpop.permute.xlu0 %1756  ;;  %v1759_v3 = vpop.permute.xlu2 %1758  ;;  %v1905_v1 = vmul.f32 %v1881_v46, %v1881_v46  ;;  %v1906_v35 = vmul.f32 %v1882_v21, %v1882_v21 }
 0x25b   : > { %v1943_v43 = vmul.f32 %v4004_v63, %v1901_v58  ;;  %v1829_v19 = vsel %vm1824_vm13, %v1820_v4, %v1757_v44  ;;  %v1727_v20 = vpop.permute.xlu1 %1726  ;;  %v1944_v17 = vmul.f32 %v3993_v18, %v1902_v2  ;;  %v1945_v27 = vmul.f32 %v4094_v9, %v1903_v48 }
 0x25c   : > { %v1946_v56 = vmul.f32 %v4004_v63, %v1904_v16  ;;  %v1840_v54 = vperm.slane %v1829_v19, 0  ;;  %v1821_v52 = vsel %vm1815_vm12, %v4372_v34, %v1727_v20  ;;  %v1947_v34 = vmul.f32 %v3993_v18, %v1905_v1 }
 0x25d   : > { %v1985_v29 = vmul.f32 1.442695, %v1943_v43  ;;  %v1830_v45 = vsel %vm1824_vm13, %v1821_v52, %v1759_v3  ;;  %2113 = vmatmul.f32.gmra.mxu3 %v2963_v41  ;;  %v1987_v50 = vmul.f32 1.442695, %v1944_v17  ;;  %v1948_v15 = vmul.f32 %v4094_v9, %v1906_v35 }
 0x25e   : > { %v1991_v25 = vmul.f32 1.442695, %v1946_v56  ;;  %v1871_v26 = vsub.f32 %v1840_v54, %v4006_v31  ;;  %v1872_v42 = vsub.f32 %v1840_v54, %v4048_v57  ;;  %v1841_v51 = vperm.slane %v1830_v45, 0 }
 0x25f   : > { %2964 = vpow2.f32 %v1985_v29  ;;  %v1993_v55 = vmul.f32 1.442695, %v1947_v34  ;;  %v1873_v36 = vsub.f32 %v1840_v54, %v4039_v0  ;;  %v1989_v37 = vmul.f32 1.442695, %v1945_v27 }
 0x260   : > { %2966 = vpow2.f32 %v1991_v25  ;;  %v1895_v38 = vmul.f32 %v1871_v26, %v1871_v26  ;;  %v1874_v11 = vsub.f32 %v1841_v51, %v4006_v31  ;;  %v1875_v22 = vsub.f32 %v1841_v51, %v4048_v57 }
 0x261   : > { %v1896_v28 = vmul.f32 %v1872_v42, %v1872_v42  ;;  %v1876_v60 = vsub.f32 %v1841_v51, %v4039_v0  ;;  %v1897_v61 = vmul.f32 %v1873_v36, %v1873_v36  ;;  %v1995_v32 = vmul.f32 1.442695, %v1948_v15 }
 0x262   : > { %v1937_v13 = vmul.f32 %v4004_v63, %v1895_v38  ;;  %v1898_v12 = vmul.f32 %v1874_v11, %v1874_v11  ;;  %v1899_v8 = vmul.f32 %v1875_v22, %v1875_v22 }
 0x263   : > { %v1938_v31 = vmul.f32 %v3993_v18, %v1896_v28  ;;  %v1900_v39 = vmul.f32 %v1876_v60, %v1876_v60  ;;  %v1939_v23 = vmul.f32 %v4094_v9, %v1897_v61 }
 0x264   : > { %v1973_v40 = vmul.f32 1.442695, %v1937_v13  ;;  %v1940_v7 = vmul.f32 %v4004_v63, %v1898_v12  ;;  %v1941_v63 = vmul.f32 %v3993_v18, %v1899_v8 }
 0x265   : > { %v2965_v33 = vpop.eup %2964  ;;  %v1975_v5 = vmul.f32 1.442695, %v1938_v31  ;;  %v1942_v18 = vmul.f32 %v4094_v9, %v1900_v39  ;;  %v1977_v0 = vmul.f32 1.442695, %v1939_v23 }
 0x266   : > { %v2967_v24 = vpop.eup %2966  ;;  %2968 = vpow2.f32 %v1973_v40  ;;  %2185 = vmatmul.f32.vlgmr.msrb.gmra.mxu2 %v2965_v33  ;;  %v1979_v57 = vmul.f32 1.442695, %v1940_v7  ;;  %v1981_v49 = vmul.f32 1.442695, %v1941_v63 }
 0x267   : > { %2211 = vmatmul.f32.vlgmr.msrb.gmra.mxu3 %v2967_v24  ;;  %2970 = vpow2.f32 %v1987_v50  ;;  %v1983_v30 = vmul.f32 1.442695, %v1942_v18 }
 0x268   : > { %2972 = vpow2.f32 %v1993_v55 }
 0x269   : > { %2974 = vpow2.f32 %v1979_v57 }
 0x26a   : > { %2976 = vpow2.f32 %v1975_v5 }
 0x26b   : > { %2978 = vpow2.f32 %v1989_v37 }
 0x26c   : > { %v2969_v62 = vpop.eup %2968  ;;  %2980 = vpow2.f32 %v1995_v32 }
 0x26d   : > { %v2971_v53 = vpop.eup %2970  ;;  %2133 = vmatmul.f32.vlgmr.msrb.gmra.mxu0 %v2969_v62  ;;  %2982 = vpow2.f32 %v1981_v49 }
 0x26e   : > { %v2973_v47 = vpop.eup %2972  ;;  %2188 = vmatmul.f32.gmra.mxu2 %v2971_v53  ;;  %2984 = vpow2.f32 %v1977_v0 }
 0x26f   : > { %v2975_v14 = vpop.eup %2974  ;;  %2214 = vmatmul.f32.gmra.mxu3 %v2973_v47  ;;  %2986 = vpow2.f32 %v1983_v30 }
 0x270   : > { %2159 = vmatmul.f32.vlgmr.msrb.gmra.mxu1 %v2975_v14  ;;  %v2977_v10 = vpop.eup %2976 }
 0x271   : > { %v2979_v59 = vpop.eup %2978 }
 0x272   : > { %v2981_v46 = vpop.eup %2980 }
 0x273   : > { %v2983_v58 = vpop.eup %2982 }
 0x274   : > { %v2985_v16 = vpop.eup %2984 }
 0x275   : > { %2136 = vmatmul.f32.gmra.mxu0 %v2977_v10  ;;  %v2987_v44 = vpop.eup %2986 }
 0x276   : > { %2191 = vmatmul.f32.gmra.mxu2 %v2979_v59 }
 0x277   : > { %2217 = vmatmul.f32.gmra.mxu3 %v2981_v46 }
 0x278   : > { %2162 = vmatmul.f32.gmra.mxu1 %v2983_v58 }
 0x27d   : > { %2139 = vmatmul.f32.gmra.mxu0 %v2985_v16 }
 0x280   : > { %2165 = vmatmul.f32.gmra.mxu1 %v2987_v44 }
 0x282   : > { %v2056_v4 = vpop.f32.mrf.mxu1 }
 0x283   : > { %v2248_v3 = vadd.f32 1.0, %v2056_v4  ;;  %v2251_v2 = vmul.f32 -0.5, %v2056_v4  ;;  %v2254_v43 = vand.u32 2147483647, %v2056_v4 }
 0x285   : > { %2988 = vlog2.f32 %v2248_v3  ;;  %v2252_v9 = vadd.f32 1.0, %v2251_v2  ;;  %vm2255_vm1 = vcmp.lt.f32.partialorder %v2254_v43, 0.0004427343 }
 0x287   : > { %v2253_v41 = vmul.f32 %v2252_v9, %v2056_v4 }
 0x28a   : > { %v2059_v19 = vpop.f32.mrf.mxu1 }
 0x28b   : > { %v2989_v20 = vpop.eup %2988  ;;  %v2257_v51 = vadd.f32 1.0, %v2059_v19  ;;  %v2260_v48 = vmul.f32 -0.5, %v2059_v19  ;;  %v2263_v31 = vand.u32 2147483647, %v2059_v19 }
 0x28c   : > { %v2250_v1 = vmul.f32 0.6931472, %v2989_v20 }
 0x28d   : > { %v2261_v7 = vadd.f32 1.0, %v2260_v48  ;;  %vm2264_vm3 = vcmp.lt.f32.partialorder %v2263_v31, 0.0004427343 }
 0x28e   : > { %v2256_v56 = vsel %vm2255_vm1, %v2253_v41, %v2250_v1 }
 0x28f   : > { %v2448_v54 = vsel %vm2437_vm0, %v2256_v56, 0.0  ;;  %v2262_v60 = vmul.f32 %v2261_v7, %v2059_v19 }
 0x290   : > { %2449 = vadd.xlane.f32.xlu2 %v2448_v54 }
 0x292   : > { %v2062_v52 = vpop.f32.mrf.mxu1 }
 0x293   : > { %v2266_v29 = vadd.f32 1.0, %v2062_v52  ;;  %v2269_v45 = vmul.f32 -0.5, %v2062_v52  ;;  %v2272_v26 = vand.u32 2147483647, %v2062_v52 }
 0x295   : > { %2990 = vlog2.f32 %v2266_v29  ;;  %v2270_v25 = vadd.f32 1.0, %v2269_v45  ;;  %vm2273_vm15 = vcmp.lt.f32.partialorder %v2272_v26, 0.0004427343 }
 0x297   : > { %v2271_v17 = vmul.f32 %v2270_v25, %v2062_v52 }
 0x29b   : > { %v2991_v42 = vpop.eup %2990  ;;  %v2030_v6 = vpop.f32.mrf.mxu0 }
 0x29c   : > { %v2221_v21 = vadd.f32 1.0, %v2030_v6  ;;  %v2268_v38 = vmul.f32 0.6931472, %v2991_v42  ;;  %v2224_v34 = vmul.f32 -0.5, %v2030_v6  ;;  %v2227_v13 = vand.u32 2147483647, %v2030_v6 }
 0x29e   : > { %2992 = vlog2.f32 %v2221_v21  ;;  %v2274_v11 = vsel %vm2273_vm15, %v2271_v17, %v2268_v38  ;;  %v2225_v28 = vadd.f32 1.0, %v2224_v34  ;;  %vm2228_vm2 = vcmp.lt.f32.partialorder %v2227_v13, 0.0004427343 }
 0x29f   : > { %v2454_v22 = vsel %vm2444_vm14, %v2274_v11, 0.0  ;;  %2994 = vlog2.f32 %v2257_v51 }
 0x2a0   : > { %2455 = vadd.xlane.f32.xlu2 %v2454_v22  ;;  %v2226_v40 = vmul.f32 %v2225_v28, %v2030_v6 }
 0x2a3   : > { %v2033_v12 = vpop.f32.mrf.mxu0 }
 0x2a4   : > { %v2993_v50 = vpop.eup %2992  ;;  %v2230_v35 = vadd.f32 1.0, %v2033_v12  ;;  %v2233_v55 = vmul.f32 -0.5, %v2033_v12  ;;  %v2236_v15 = vand.u32 2147483647, %v2033_v12 }
 0x2a5   : > { %v2223_v33 = vmul.f32 0.6931472, %v2993_v50  ;;  %v2995_v8 = vpop.eup %2994 }
 0x2a6   : > { %2996 = vlog2.f32 %v2230_v35  ;;  %v2234_v57 = vadd.f32 1.0, %v2233_v55  ;;  %v2259_v27 = vmul.f32 0.6931472, %v2995_v8  ;;  %vm2237_vm4 = vcmp.lt.f32.partialorder %v2236_v15, 0.0004427343 }
 0x2a7   : > { %v2229_v24 = vsel %vm2228_vm2, %v2226_v40, %v2223_v33 }
 0x2a8   : > { %v2438_v36 = vsel %vm2437_vm0, %v2229_v24, 0.0  ;;  %v2235_v37 = vmul.f32 %v2234_v57, %v2033_v12  ;;  %v2265_v32 = vsel %vm2264_vm3, %v2262_v60, %v2259_v27 }
 0x2a9   : > { %2439 = vadd.xlane.f32.xlu1 %v2438_v36  ;;  %v2451_v49 = vsel %vm2437_vm0, %v2265_v32, 0.0 }
 0x2ab   : > { %v2036_v63 = vpop.f32.mrf.mxu0 }
 0x2ac   : > { %v2997_v61 = vpop.eup %2996  ;;  %v2239_v5 = vadd.f32 1.0, %v2036_v63  ;;  %v2242_v62 = vmul.f32 -0.5, %v2036_v63  ;;  %v2245_v14 = vand.u32 2147483647, %v2036_v63 }
 0x2ad   : > { %v2232_v53 = vmul.f32 0.6931472, %v2997_v61 }
 0x2ae   : > { %2998 = vlog2.f32 %v2239_v5  ;;  %v2243_v23 = vadd.f32 1.0, %v2242_v62  ;;  %vm2246_vm5 = vcmp.lt.f32.partialorder %v2245_v14, 0.0004427343 }
 0x2af   : > { %v2238_v39 = vsel %vm2237_vm4, %v2235_v37, %v2232_v53 }
 0x2b0   : > { %v2441_v47 = vsel %vm2437_vm0, %v2238_v39, 0.0  ;;  %v2244_v0 = vmul.f32 %v2243_v23, %v2036_v63 }
 0x2b1   : > { %2452 = vadd.xlane.f32.xlu1 %v2451_v49  ;;  %2442 = vadd.xlane.f32.xlu0 %v2441_v47 }
 0x2b4   : > { %v2999_v18 = vpop.eup %2998 }
 0x2b5   : > { %v2241_v10 = vmul.f32 0.6931472, %v2999_v18 }
 0x2b7   : > { %v2247_v59 = vsel %vm2246_vm5, %v2244_v0, %v2241_v10 }
 0x2b8   : > { %v2445_v30 = vsel %vm2444_vm14, %v2247_v59, 0.0 }
 0x2b9   : > { %2446 = vadd.xlane.f32.xlu0 %v2445_v30 }
 0x2c8   : > { %v2082_v46 = vpop.f32.mrf.mxu2 }
 0x2c9   : > { %v2275_v58 = vadd.f32 1.0, %v2082_v46  ;;  %v2278_v16 = vmul.f32 -0.5, %v2082_v46  ;;  %v2281_v4 = vand.u32 2147483647, %v2082_v46 }
 0x2cb   : > { %3000 = vlog2.f32 %v2275_v58  ;;  %v2279_v44 = vadd.f32 1.0, %v2278_v16  ;;  %vm2282_vm6 = vcmp.lt.f32.partialorder %v2281_v4, 0.0004427343 }
 0x2cd   : > { %v2280_v20 = vmul.f32 %v2279_v44, %v2082_v46 }
 0x2d0   : > { %v2085_v3 = vpop.f32.mrf.mxu2  ;;  %v2108_v2 = vpop.f32.mrf.mxu3 }
 0x2d1   : > { %v3001_v9 = vpop.eup %3000  ;;  %v2284_v43 = vadd.f32 1.0, %v2085_v3  ;;  %v2302_v19 = vadd.f32 1.0, %v2108_v2  ;;  %v2287_v41 = vmul.f32 -0.5, %v2085_v3  ;;  %v2305_v56 = vmul.f32 -0.5, %v2108_v2 }
 0x2d2   : > { %v2277_v1 = vmul.f32 0.6931472, %v3001_v9  ;;  %v2290_v45 = vand.u32 2147483647, %v2085_v3  ;;  %v2308_v6 = vand.u32 2147483647, %v2108_v2 }
 0x2d3   : > { %3002 = vlog2.f32 %v2284_v43  ;;  %v2288_v29 = vadd.f32 1.0, %v2287_v41  ;;  %v2306_v25 = vadd.f32 1.0, %v2305_v56 }
 0x2d4   : > { %3004 = vlog2.f32 %v2302_v19  ;;  %v2283_v54 = vsel %vm2282_vm6, %v2280_v20, %v2277_v1  ;;  %vm2291_vm7 = vcmp.lt.f32.partialorder %v2290_v45, 0.0004427343  ;;  %vm2309_vm8 = vcmp.lt.f32.partialorder %v2308_v6, 0.0004427343 }
 0x2d5   : > { %v2457_v52 = vsel %vm2437_vm0, %v2283_v54, 0.0  ;;  %v2289_v34 = vmul.f32 %v2288_v29, %v2085_v3  ;;  %v2307_v28 = vmul.f32 %v2306_v25, %v2108_v2 }
 0x2d6   : > { %2458 = vadd.xlane.f32.xlu1 %v2457_v52 }
 0x2d8   : > { %v2088_v26 = vpop.f32.mrf.mxu2  ;;  %v2111_v42 = vpop.f32.mrf.mxu3 }
 0x2d9   : > { %v3003_v51 = vpop.eup %3002  ;;  %v2293_v17 = vadd.f32 1.0, %v2088_v26  ;;  %v2311_v21 = vadd.f32 1.0, %v2111_v42  ;;  %v2296_v11 = vmul.f32 -0.5, %v2088_v26  ;;  %v2314_v13 = vmul.f32 -0.5, %v2111_v42 }
 0x2da   : > { %v3005_v38 = vpop.eup %3004  ;;  %v2286_v22 = vmul.f32 0.6931472, %v3003_v51  ;;  %v2299_v8 = vand.u32 2147483647, %v2088_v26  ;;  %v2317_v24 = vand.u32 2147483647, %v2111_v42 }
 0x2db   : > { %3006 = vlog2.f32 %v2293_v17  ;;  %v2304_v48 = vmul.f32 0.6931472, %v3005_v38  ;;  %v2297_v40 = vadd.f32 1.0, %v2296_v11  ;;  %v2315_v33 = vadd.f32 1.0, %v2314_v13 }
 0x2dc   : > { %3008 = vlog2.f32 %v2311_v21  ;;  %v2292_v12 = vsel %vm2291_vm7, %v2289_v34, %v2286_v22  ;;  %vm2300_vm9 = vcmp.lt.f32.partialorder %v2299_v8, 0.0004427343  ;;  %vm2318_vm10 = vcmp.lt.f32.partialorder %v2317_v24, 0.0004427343 }
 0x2dd   : > { %v2460_v50 = vsel %vm2437_vm0, %v2292_v12, 0.0  ;;  %v2310_v35 = vsel %vm2309_vm8, %v2307_v28, %v2304_v48  ;;  %v2298_v27 = vmul.f32 %v2297_v40, %v2088_v26  ;;  %v2316_v63 = vmul.f32 %v2315_v33, %v2111_v42 }
 0x2de   : > { %2461 = vadd.xlane.f32.xlu0 %v2460_v50  ;;  %v2466_v55 = vsel %vm2437_vm0, %v2310_v35, 0.0 }
 0x2df   : > { %2467 = vadd.xlane.f32.xlu1 %v2466_v55 }
 0x2e0   : > { %v2114_v7 = vpop.f32.mrf.mxu3 }
 0x2e1   : > { %v3007_v36 = vpop.eup %3006  ;;  %v2320_v31 = vadd.f32 1.0, %v2114_v7  ;;  %v2323_v15 = vmul.f32 -0.5, %v2114_v7  ;;  %v2326_v39 = vand.u32 2147483647, %v2114_v7 }
 0x2e2   : > { %v3009_v57 = vpop.eup %3008  ;;  %v2295_v60 = vmul.f32 0.6931472, %v3007_v36 }
 0x2e3   : > { %3010 = vlog2.f32 %v2320_v31  ;;  %v2313_v61 = vmul.f32 0.6931472, %v3009_v57  ;;  %v2324_v32 = vadd.f32 1.0, %v2323_v15  ;;  %vm2327_vm11 = vcmp.lt.f32.partialorder %v2326_v39, 0.0004427343 }
 0x2e4   : > { %v2301_v5 = vsel %vm2300_vm9, %v2298_v27, %v2295_v60 }
 0x2e5   : > { %v2463_v37 = vsel %vm2444_vm14, %v2301_v5, 0.0  ;;  %v2319_v62 = vsel %vm2318_vm10, %v2316_v63, %v2313_v61  ;;  %v2325_v47 = vmul.f32 %v2324_v32, %v2114_v7  ;;  %vm2605_vm10 = vcmask 1044480  }
 0x2e6   : > { %2464 = vadd.xlane.f32.xlu2 %v2463_v37  ;;  %v2469_v53 = vsel %vm2437_vm0, %v2319_v62, 0.0 }
 0x2e7   : > { %2470 = vadd.xlane.f32.xlu0 %v2469_v53 }
 0x2e9   : > { %v3011_v49 = vpop.eup %3010  ;;  %v4472_v10 = vpop.f32.mrf.mxu2 }
 0x2ea   : > { %v2134_v23 = vpop.f32.mrf.mxu0  ;;  %v2322_v14 = vmul.f32 0.6931472, %v3011_v49  ;;  %v2383_v43 = vadd.f32 1.0, %v4472_v10  ;;  %v4476_v19 = vpop.f32.mrf.mxu3  ;;  %v2386_v34 = vmul.f32 -0.5, %v4472_v10  ;;  %v2389_v27 = vand.u32 2147483647, %v4472_v10 }
 0x2eb   : > { %v2329_v18 = vadd.f32 1.0, %v2134_v23  ;;  %v2332_v59 = vmul.f32 -0.5, %v2134_v23  ;;  %v2335_v4 = vand.u32 2147483647, %v2134_v23  ;;  %v2410_v26 = vadd.f32 1.0, %v4476_v19 }
 0x2ec   : > { %v2328_v0 = vsel %vm2327_vm11, %v2325_v47, %v2322_v14  ;;  %v2387_v36 = vadd.f32 1.0, %v2386_v34  ;;  %v2413_v53 = vmul.f32 -0.5, %v4476_v19  ;;  %vm4512_vm15 = vcmp.lt.f32.partialorder %v2389_v27, 0.0004427343 }
 0x2ed   : > { %v2160_v30 = vpop.f32.mrf.mxu1  ;;  %v2472_v46 = vsel %vm2444_vm14, %v2328_v0, 0.0  ;;  %3012 = vlog2.f32 %v2329_v18  ;;  %v2333_v16 = vadd.f32 1.0, %v2332_v59  ;;  %vm2336_vm12 = vcmp.lt.f32.partialorder %v2335_v4, 0.0004427343 }
 0x2ee   : > { %v2356_v58 = vadd.f32 1.0, %v2160_v30  ;;  %2473 = vadd.xlane.f32.xlu2 %v2472_v46  ;;  %v2359_v3 = vmul.f32 -0.5, %v2160_v30  ;;  %v2362_v6 = vand.u32 2147483647, %v2160_v30  ;;  %v2388_v47 = vmul.f32 %v2387_v36, %v4472_v10 }
 0x2ef   : > { %v2334_v20 = vmul.f32 %v2333_v16, %v2134_v23  ;;  %vm2551_vm11 = vcmask 195712  }
 0x2f0   : > { %3014 = vlog2.f32 %v2356_v58  ;;  %v2360_v29 = vadd.f32 1.0, %v2359_v3  ;;  %vm4488_vm13 = vcmp.lt.f32.partialorder %v2362_v6, 0.0004427343  ;;  %v2414_v3 = vadd.f32 1.0, %v2413_v53 }
 0x2f1   : > { %v4481_v45 = vpop.f32.mrf.mxu2 }
 0x2f2   : > { %v2137_v44 = vpop.f32.mrf.mxu0  ;;  %v2361_v11 = vmul.f32 %v2360_v29, %v2160_v30  ;;  %v2392_v13 = vadd.f32 1.0, %v4481_v45  ;;  %v4497_v31 = vpop.f32.mrf.mxu3  ;;  %v2395_v23 = vmul.f32 -0.5, %v4481_v45 }
 0x2f3   : > { %v2338_v2 = vadd.f32 1.0, %v2137_v44  ;;  %v3013_v9 = vpop.eup %3012  ;;  %v2341_v41 = vmul.f32 -0.5, %v2137_v44  ;;  %v2344_v38 = vand.u32 2147483647, %v2137_v44  ;;  %v2419_v0 = vadd.f32 1.0, %v4497_v31 }
 0x2f4   : > { %v2331_v56 = vmul.f32 0.6931472, %v3013_v9  ;;  %v2416_v9 = vand.u32 2147483647, %v4476_v19 }
 0x2f5   : > { %v4478_v1 = vpop.f32.mrf.mxu1  ;;  %3016 = vlog2.f32 %v2338_v2  ;;  %v2342_v51 = vadd.f32 1.0, %v2341_v41  ;;  %vm2345_vm1 = vcmp.lt.f32.partialorder %v2344_v38, 0.0004427343 }
 0x2f6   : > { %v3015_v54 = vpop.eup %3014  ;;  %v2365_v52 = vadd.f32 1.0, %v4478_v1  ;;  %v2337_v25 = vsel %vm2336_vm12, %v2334_v20, %v2331_v56  ;;  %3018 = vlog2.f32 %v2383_v43  ;;  %v2368_v48 = vmul.f32 -0.5, %v4478_v1 }
 0x2f7   : > { %v2475_v42 = vsel %vm2437_vm0, %v2337_v25, 0.0  ;;  %v2358_v17 = vmul.f32 0.6931472, %v3015_v54  ;;  %v2343_v50 = vmul.f32 %v2342_v51, %v2137_v44  ;;  %v2371_v62 = vand.u32 2147483647, %v4478_v1 }
 0x2f8   : > { %3020 = vlog2.f32 %v2365_v52  ;;  %2476 = vadd.xlane.f32.xlu1 %v2475_v42  ;;  %v2369_v15 = vadd.f32 1.0, %v2368_v48  ;;  %v2396_v20 = vadd.f32 1.0, %v2395_v23  ;;  %v2398_v42 = vand.u32 2147483647, %v4481_v45 }
 0x2f9   : > { %3022 = vlog2.f32 %v2410_v26  ;;  %v2364_v33 = vsel %vm4488_vm13, %v2361_v11, %v2358_v17  ;;  %v4502_v61 = vpop.f32.mrf.mxu2  ;;  %vm4518_vm2 = vcmp.lt.f32.partialorder %v2371_v62, 0.0004427343  ;;  %v2415_v17 = vmul.f32 %v2414_v3, %v4476_v19 }
 0x2fa   : > { %v2140_v21 = vpop.f32.mrf.mxu0  ;;  %v2484_v63 = vsel %vm2437_vm0, %v2364_v33, 0.0  ;;  %v2370_v59 = vmul.f32 %v2369_v15, %v4478_v1  ;;  %v2401_v30 = vadd.f32 1.0, %v4502_v61  ;;  %v2218_v25 = vpop.f32.mrf.mxu3  ;;  %v2404_v38 = vmul.f32 -0.5, %v4502_v61 }
 0x2fb   : > { %v2347_v22 = vadd.f32 1.0, %v2140_v21  ;;  %v3017_v28 = vpop.eup %3016  ;;  %v2350_v35 = vmul.f32 -0.5, %v2140_v21  ;;  %v2353_v39 = vand.u32 2147483647, %v2140_v21  ;;  %v2397_v11 = vmul.f32 %v2396_v20, %v4481_v45  ;;  %v2630_v20 = vld [vmem:[%s4663_s7] sm:$0xff] }
 0x2fc   : > { %v2340_v55 = vmul.f32 0.6931472, %v3017_v28  ;;  %v3019_v8 = vpop.eup %3018  ;;  %vm2417_vm4 = vcmp.lt.f32.partialorder %v2416_v9, 0.0004427343  ;;  %vm2399_vm6 = vcmp.lt.f32.partialorder %v2398_v42, 0.0004427343 }
 0x2fd   : > { %v4492_v40 = vpop.f32.mrf.mxu1  ;;  %3024 = vlog2.f32 %v2347_v22  ;;  %v2351_v5 = vadd.f32 1.0, %v2350_v35  ;;  %v2385_v37 = vmul.f32 0.6931472, %v3019_v8  ;;  %vm2354_vm3 = vcmp.lt.f32.partialorder %v2353_v39, 0.0004427343 }
 0x2fe   : > { %v2374_v7 = vadd.f32 1.0, %v4492_v40  ;;  %v3021_v24 = vpop.eup %3020  ;;  %v2346_v57 = vsel %vm2345_vm1, %v2343_v50, %v2340_v55  ;;  %v2377_v14 = vmul.f32 -0.5, %v4492_v40  ;;  %v2380_v29 = vand.u32 2147483647, %v4492_v40 }
 0x2ff   : > { %v2478_v60 = vsel %vm2437_vm0, %v2346_v57, 0.0  ;;  %v3023_v32 = vpop.eup %3022  ;;  %v2367_v49 = vmul.f32 0.6931472, %v3021_v24  ;;  %v2352_v58 = vmul.f32 %v2351_v5, %v2140_v21  ;;  %v2391_v10 = vsel %vm4512_vm15, %v2388_v47, %v2385_v37 }
 0x300   : > { %3026 = vlog2.f32 %v2374_v7  ;;  %2479 = vadd.xlane.f32.xlu0 %v2478_v60  ;;  %2485 = vadd.xlane.f32.xlu1 %v2484_v63  ;;  %v2378_v41 = vadd.f32 1.0, %v2377_v14  ;;  %v2412_v56 = vmul.f32 0.6931472, %v3023_v32  ;;  %v2493_v52 = vsel %vm2437_vm0, %v2391_v10, 0.0 }
 0x301   : > { %3028 = vlog2.f32 %v2392_v13  ;;  %v2373_v2 = vsel %vm4518_vm2, %v2370_v59, %v2367_v49  ;;  %v2422_v21 = vmul.f32 -0.5, %v4497_v31  ;;  %v2428_v22 = vadd.f32 1.0, %v2218_v25 }
 0x302   : > { %3030 = vlog2.f32 %v2401_v30  ;;  %v2487_v26 = vsel %vm2437_vm0, %v2373_v2, 0.0  ;;  %v2379_v34 = vmul.f32 %v2378_v41, %v4492_v40  ;;  %vm2381_vm5 = vcmp.lt.f32.partialorder %v2380_v29, 0.0004427343 }
 0x303   : > { %v3025_v18 = vpop.eup %3024  ;;  %3032 = vlog2.f32 %v2419_v0  ;;  %v2418_v28 = vsel %vm2417_vm4, %v2415_v17, %v2412_v56  ;;  %v2423_v35 = vadd.f32 1.0, %v2422_v21  ;;  %v2405_v55 = vadd.f32 1.0, %v2404_v38  ;;  %v2450_v14 = vpop.xlane.xlu2 %2449  ;;  %v2513_v0 = vld [vmem:[%s4661_s5 + $0x10] sm:$0x1f] }
 0x304   : > { %v2349_v16 = vmul.f32 0.6931472, %v3025_v18  ;;  %3034 = vlog2.f32 %v2428_v22  ;;  %v2502_v19 = vsel %vm2437_vm0, %v2418_v28, 0.0  ;;  %v2407_v40 = vand.u32 2147483647, %v4502_v61  ;;  %2841 = vmatpush.msk.msra.mxu0 %vm2605_vm10, %v2513_v0 }
 0x305   : > { %v2425_v8 = vand.u32 2147483647, %v4497_v31  ;;  %v2406_v36 = vmul.f32 %v2405_v55, %v4502_v61  ;;  %v2431_v57 = vmul.f32 -0.5, %v2218_v25  ;;  %v2424_v27 = vmul.f32 %v2423_v35, %v4497_v31 }
 0x306   : > { %v3027_v4 = vpop.eup %3026  ;;  %v2355_v1 = vsel %vm2354_vm3, %v2352_v58, %v2349_v16  ;;  %vm2408_vm7 = vcmp.lt.f32.partialorder %v2407_v40, 0.0004427343  ;;  %v2434_v37 = vand.u32 2147483647, %v2218_v25  ;;  %v2512_v58 = vld [vmem:[%s4661_s5 + $0x8] sm:$0xff]  ;;  %v2542_v41 = vlaneseq }
 0x307   : > { %v3029_v43 = vpop.eup %3028  ;;  %v2481_v54 = vsel %vm2444_vm14, %v2355_v1, 0.0  ;;  %v2376_v6 = vmul.f32 0.6931472, %v3027_v4  ;;  %vm2426_vm8 = vcmp.lt.f32.partialorder %v2425_v8, 0.0004427343  ;;  %v2432_v5 = vadd.f32 1.0, %v2431_v57  ;;  %2623 = vmatpush.msra.mxu0 %v2512_v58 }
 0x308   : > { %2482 = vadd.xlane.f32.xlu2 %v2481_v54  ;;  %2494 = vadd.xlane.f32.xlu1 %v2493_v52  ;;  %v2394_v51 = vmul.f32 0.6931472, %v3029_v43  ;;  %v3031_v48 = vpop.eup %3030  ;;  %vm2435_vm9 = vcmp.lt.f32.partialorder %v2434_v37, 0.0004427343  ;;  %v2511_v4 = vld [vmem:[%s4661_s5] sm:$0xff]  ;;  %v4561_v52 = vand.u32 127, %v2542_v41 }
 0x309   : > { %2488 = vadd.xlane.f32.xlu0 %v2487_v26  ;;  %v2382_v13 = vsel %vm2381_vm5, %v2379_v34, %v2376_v6  ;;  %v3033_v50 = vpop.eup %3032  ;;  %v2403_v7 = vmul.f32 0.6931472, %v3031_v48  ;;  %v2433_v39 = vmul.f32 %v2432_v5, %v2218_v25  ;;  %2624 = vmatpush.msra.mxu0 %v2511_v4  ;;  %v2631_v43 = vld [vmem:[%s4663_s7 + $0x8] sm:$0x3]  ;;  %vm2588_vm12 = vcmask 1041409  }
 0x30a   : > { %v2400_v12 = vsel %vm2399_vm6, %v2397_v11, %v2394_v51  ;;  %v2490_v33 = vsel %vm2444_vm14, %v2382_v13, 0.0  ;;  %v2421_v24 = vmul.f32 0.6931472, %v3033_v50  ;;  %v3035_v60 = vpop.eup %3034  ;;  %v4564_v29 = vadd.s32 4294967288, %v4561_v52 }
 0x30b   : > { %v2496_v45 = vsel %vm2437_vm0, %v2400_v12, 0.0  ;;  %v2409_v15 = vsel %vm2408_vm7, %v2406_v36, %v2403_v7  ;;  %v2430_v32 = vmul.f32 0.6931472, %v3035_v60  ;;  %v4567_v25 = vadd.s32 4294967280, %v4561_v52 }
 0x30c   : > { %v2427_v63 = vsel %vm2426_vm8, %v2424_v27, %v2421_v24  ;;  %v2499_v62 = vsel %vm2444_vm14, %v2409_v15, 0.0  ;;  %v2553_v21 = vperm.slane %v2450_v14, %v4561_v52  ;;  %vm2590_vm13 = vcmask 1042434  }
 0x30d   : > { %v2505_v53 = vsel %vm2437_vm0, %v2427_v63, 0.0  ;;  %v2436_v61 = vsel %vm2435_vm9, %v2433_v39, %v2430_v32  ;;  %vm2640_vm0 = vcmask 1041408   ;;  %vm2592_vm1 = vcmask 1043459  }
 0x30e   : > { %v2508_v49 = vsel %vm2444_vm14, %v2436_v61, 0.0  ;;  %2843 = vmatpush.msk.msra.mxu1 %vm2640_vm0, %v2631_v43  ;;  %vm2547_vm14 = vcmask 130112   ;;  %vm2594_vm15 = vcmask 1044484   ;;  %vm2596_vm2 = vcmask 1045509   ;;  %v2905_v43 = vld [vmem:[%s4662_s6] ss:$0 sm:$0xff] }
 0x30f   : > { %vm2598_vm3 = vcmask 1046534   ;;  %vm2600_vm4 = vcmask 1047559   ;;  %vm2602_vm5 = vcmask 171008   ;;  %vm2636_vm6 = vcmask 80896  }
 0x310   : > { %2503 = vadd.xlane.f32.xlu1 %v2502_v19  ;;  %2491 = vadd.xlane.f32.xlu2 %v2490_v33  ;;  %vm2670_vm7 = vcmask 39936  }
 0x311   : > { %2497 = vadd.xlane.f32.xlu0 %v2496_v45  ;;  %2659 = vmatpush.msra.mxu1 %v2630_v20 }
 0x313   : > { %v2456_v30 = vpop.xlane.xlu2 %2455 }
 0x314   : > { %v2556_v28 = vperm.slane %v2456_v30, %v4567_v25 }
 0x318   : > { %2500 = vadd.xlane.f32.xlu2 %v2499_v62 }
 0x319   : > { %2506 = vadd.xlane.f32.xlu0 %v2505_v53 }
 0x31c   : > { %v2440_v31 = vpop.xlane.xlu1 %2439 }
 0x31d   : > { %v2544_v38 = vperm.slane %v2440_v31, %v4561_v52 }
 0x320   : > { %2509 = vadd.xlane.f32.xlu2 %v2508_v49 }
 0x324   : > { %v2443_v47 = vpop.xlane.xlu0 %2442  ;;  %v2453_v23 = vpop.xlane.xlu1 %2452 }
 0x325   : > { %v2546_v42 = vperm.slane %v2443_v47, %v4564_v29  ;;  %v2554_v6 = vperm.slane %v2453_v23, %v4564_v29 }
 0x327   : > { %v2548_v11 = vsel %vm2547_vm14, %v2546_v42, %v2544_v38  ;;  %v2555_v22 = vsel %vm2547_vm14, %v2554_v6, %v2553_v21 }
 0x328   : > { %v2557_v12 = vsel %vm2551_vm11, %v2556_v28, %v2555_v22 }
 0x32c   : > { %v2447_v18 = vpop.xlane.xlu0 %2446 }
 0x32d   : > { %v2550_v17 = vperm.slane %v2447_v18, %v4567_v25 }
 0x32f   : > { %v2552_v13 = vsel %vm2551_vm11, %v2550_v17, %v2548_v11 }
 0x330   : > { %v2589_v19 = vsel %vm2588_vm12, %v2557_v12, %v2552_v13 }
 0x349   : > { %v2459_v59 = vpop.xlane.xlu1 %2458 }
 0x34a   : > { %v2558_v33 = vperm.slane %v2459_v59, %v4561_v52 }
 0x351   : > { %v2462_v46 = vpop.xlane.xlu0 %2461 }
 0x352   : > { %v2468_v10 = vpop.xlane.xlu1 %2467  ;;  %v2559_v48 = vperm.slane %v2462_v46, %v4564_v29 }
 0x353   : > { %v2563_v8 = vperm.slane %v2468_v10, %v4561_v52 }
 0x354   : > { %v2560_v36 = vsel %vm2547_vm14, %v2559_v48, %v2558_v33 }
 0x359   : > { %v2465_v16 = vpop.xlane.xlu2 %2464 }
 0x35a   : > { %v2471_v44 = vpop.xlane.xlu0 %2470  ;;  %v2561_v50 = vperm.slane %v2465_v16, %v4567_v25 }
 0x35b   : > { %v2564_v35 = vperm.slane %v2471_v44, %v4564_v29 }
 0x35c   : > { %v2562_v63 = vsel %vm2551_vm11, %v2561_v50, %v2560_v36 }
 0x35d   : > { %v2565_v5 = vsel %vm2547_vm14, %v2564_v35, %v2563_v8  ;;  %v2591_v23 = vsel %vm2590_vm13, %v2562_v63, %v2589_v19 }
 0x361   : > { %v2474_v2 = vpop.xlane.xlu2 %2473 }
 0x362   : > { %v2566_v40 = vperm.slane %v2474_v2, %v4567_v25 }
 0x364   : > { %v2567_v32 = vsel %vm2551_vm11, %v2566_v40, %v2565_v5 }
 0x365   : > { %v2593_v0 = vsel %vm2592_vm1, %v2567_v32, %v2591_v23 }
 0x36b   : > { %v2477_v3 = vpop.xlane.xlu1 %2476 }
 0x36c   : > { %v2568_v57 = vperm.slane %v2477_v3, %v4561_v52 }
 0x373   : > { %v2480_v9 = vpop.xlane.xlu0 %2479  ;;  %v2486_v56 = vpop.xlane.xlu1 %2485 }
 0x374   : > { %v2569_v45 = vperm.slane %v2480_v9, %v4564_v29  ;;  %v2573_v37 = vperm.slane %v2486_v56, %v4561_v52  ;;  %v2665_v9 = vld [vmem:[%s4665_s9] sm:$0x1f] }
 0x375   : > { %2845 = vmatpush.msk.msra.mxu2 %vm2605_vm10, %v2665_v9  ;;  %v2906_v56 = vld [vmem:[%s4664_s8] ss:$0 sm:$0xff] }
 0x376   : > { %v2570_v53 = vsel %vm2547_vm14, %v2569_v45, %v2568_v57 }
 0x37b   : > { %v2483_v1 = vpop.xlane.xlu2 %2482  ;;  %v2495_v34 = vpop.xlane.xlu1 %2494 }
 0x37c   : > { %v2489_v54 = vpop.xlane.xlu0 %2488  ;;  %v2571_v7 = vperm.slane %v2483_v1, %v4567_v25  ;;  %v2578_v39 = vperm.slane %v2495_v34, %v4561_v52 }
 0x37d   : > { %v2574_v24 = vperm.slane %v2489_v54, %v4564_v29 }
 0x37e   : > { %v2572_v49 = vsel %vm2551_vm11, %v2571_v7, %v2570_v53 }
 0x37f   : > { %v2575_v31 = vsel %vm2547_vm14, %v2574_v24, %v2573_v37  ;;  %v2595_v58 = vsel %vm2594_vm15, %v2572_v49, %v2593_v0 }
 0x383   : > { %v2492_v26 = vpop.xlane.xlu2 %2491  ;;  %v2504_v61 = vpop.xlane.xlu1 %2503 }
 0x384   : > { %v2498_v51 = vpop.xlane.xlu0 %2497  ;;  %v2576_v15 = vperm.slane %v2492_v26, %v4567_v25  ;;  %v2583_v59 = vperm.slane %v2504_v61, %v4561_v52  ;;  %v2907_v26 = vld [vmem:[#allocation2] ss:$0 sm:$0xff] }
 0x385   : > { %v2579_v27 = vperm.slane %v2498_v51, %v4564_v29 }
 0x386   : > { %v2577_v18 = vsel %vm2551_vm11, %v2576_v15, %v2575_v31 }
 0x387   : > { %v2580_v14 = vsel %vm2547_vm14, %v2579_v27, %v2578_v39  ;;  %v2597_v10 = vsel %vm2596_vm2, %v2577_v18, %v2595_v58 }
 0x38b   : > { %v2501_v55 = vpop.xlane.xlu2 %2500 }
 0x38c   : > { %v2507_v60 = vpop.xlane.xlu0 %2506  ;;  %v2581_v62 = vperm.slane %v2501_v55, %v4567_v25 }
 0x38d   : > { %v2584_v47 = vperm.slane %v2507_v60, %v4564_v29 }
 0x38e   : > { %v2582_v30 = vsel %vm2551_vm11, %v2581_v62, %v2580_v14 }
 0x38f   : > { %v2585_v44 = vsel %vm2547_vm14, %v2584_v47, %v2583_v59  ;;  %v2599_v4 = vsel %vm2598_vm3, %v2582_v30, %v2597_v10  ;;  %vm2726_vm14 = vcmask 24576  }
 0x393   : > { %v2510_v46 = vpop.xlane.xlu2 %2509 }
 0x394   : > { %v2586_v16 = vperm.slane %v2510_v46, %v4567_v25 }
 0x396   : > { %v2587_v3 = vsel %vm2551_vm11, %v2586_v16, %v2585_v44 }
 0x397   : > { %v2601_v2 = vsel %vm2600_vm4, %v2587_v3, %v2599_v4 }
 0x398   : > { %2842 = vmatmul.msk.f32.vlgmr.msra.gmra.mxu0 %vm2602_vm5, %v2601_v2 }
 0x415   : > { %v2626_v20 = vpop.f32.mrf.mxu0 }
 0x416   : > { %v2627_v41 = vadd.f32 %v2905_v43, %v2626_v20 }
 0x418   : > { %v2629_v1 = vmax.f32 %v2627_v41, 0.0 }
 0x41a   : > { %2844 = vmatmul.msk.f32.vlgmr.msra.gmra.mxu1 %vm2636_vm6, %v2629_v1 }
 0x497   : > { %v2661_v54 = vpop.f32.mrf.mxu1 }
 0x498   : > { %v2662_v29 = vadd.f32 %v2906_v56, %v2661_v54 }
 0x49a   : > { %v2664_v25 = vmax.f32 %v2662_v29, 0.0 }
 0x49c   : > { %2846 = vmatmul.msk.f32.vlgmr.msra.gmra.mxu2 %vm2670_vm7, %v2664_v25 }
 0x51f   : > { %v2694_v42 = vpop.f32.mrf.mxu2 }
 0x520   : > { %v2695_v6 = vadd.f32 %v2907_v26, %v2694_v42 }
 0x522   : > { %v2698_v51 = vrot.slane %v2695_v6, 4 }
 0x524   : > { %v2700_v17 = vsub.f32 %v2695_v6, %v2698_v51 }
 0x526   : > { %v2847_v21 = vmul.f32 -1.442695, %v2700_v17 }
 0x528   : > { %3036 = vpow2.f32 %v2847_v21 }
 0x52e   : > { %v3037_v38 = vpop.eup %3036 }
 0x52f   : > { %v2704_v34 = vadd.f32 1.0, %v3037_v38 }
 0x531   : > { %3038 = vrcp.f32 %v2704_v34  ;;  %v2716_v13 = vand.u32 2147483648, %v2704_v34  ;;  %v2714_v12 = vand.u32 2147483647, %v2704_v34  ;;  %vm2710_vm9 = vweird.f32 %v2704_v34 }
 0x533   : > { %v2717_v35 = vor.u32 1.1754944e-38, %v2716_v13  ;;  %vm2715_vm0 = vcmp.eq.f32.partialorder %v2714_v12, 8.507059e+37 }
 0x537   : > { %v3039_v11 = vpop.eup %3038 }
 0x538   : > { %v2706_v22 = vmul.f32 %v3039_v11, %v2704_v34  ;;  %vm2711_vm8 = vweird.f32 %v3039_v11 }
 0x539   : > { %vm2712_vm10 = vmor %vm2710_vm9, %vm2711_vm8 }
 0x53a   : > { %v2707_v28 = vsub.f32 1.0, %v2706_v22 }
 0x53c   : > { %v2708_v48 = vmul.f32 %v3039_v11, %v2707_v28 }
 0x53e   : > { %v2709_v50 = vadd.f32 %v3039_v11, %v2708_v48 }
 0x540   : > { %v2713_v55 = vsel %vm2712_vm10, %v3039_v11, %v2709_v50 }
 0x541   : > { %v2718_v19 = vsel %vm2715_vm0, %v2717_v35, %v2713_v55 }
 0x542   : > { %2722 = vperm.xlu1 %2903, %v2718_v19  }
 0x5b4   : > { %v2723_v33 = vpop.permute.xlu1 %2722 }
 0x5b5   : > { %v2724_v40 = vperm.slane %v2723_v33, %v4561_v52 }
 0x5b7   : > { %2727 = vst.msk [vmem:[%s630_s13] sm:$0x1] %vm2726_vm14, %v2724_v40 }
 0x5b8   : > { %3067 = shalt.err (!%p3064_p5)
}
 0x5b9   : > { %2853 = dma.vmem_to_hbm [thread:$0]  (%p3219_p6), %s2740_s10, 16, %s2742_s16, %s2729_s17  }
 0x5ba PF: > { %s2753_s15 = sand.u32 1, %s3090_s19   ;;  %p2856_p7 = pnand %p2822_p9, %p3223_p8 }
 0x5bb   : > { %s2754_s13 = scalar_lea.sflag [#allocation6], %s2753_s15 }
 0x5bc   : > { %p2857_p10 = pneg %p2856_p7 }
 0x5be   : > { %3085 = dma.done.wait (%p2857_p10), %s2754_s13, 16  }
 0x5bf   : > { %3087 = vsyncadd (%p2857_p10), %s2754_s13, 4294967280  ;;  %p23_p11 = scmp.ge.s32.totalorder %s3200_s24, 4   ;;  %s4691_s19 = smov %s3094_s20 }
 0x5c0   : > { %s4692_s20 = smov %s3098_s21  ;;  %s4693_s21 = smov %s3213_s27 }
 0x5c1   : > { %s4694_s22 = smov %s3200_s24  ;;  %25 = sbr.rel (!%p23_p11) target bundleno = 6 (0x6), region = 188 }
 0x5c6   :  { %2759 = vsyncpa [#allocation6], 1 }
 0x5c7   :  { %2761 = vsyncpa [#allocation6 + $0x1], 1 }

</bundles_post_ra>
